<compile_context>
chip_gen: v7x
topology: tpu7x:2x2x1
jax: 0.10.0
libtpu: 0.0.40
codegen_flags: <defaults>
</compile_context>

<pallas_src>
import jax
import jax.numpy as jnp
from jax.experimental import pallas as pl
from jax.experimental.pallas import tpu as pltpu

# Layer dims: 64→60→56→52→48→44→40→36→40→44→48→52→56→60→64
DIMS = [64, 60, 56, 52, 48, 44, 40, 36, 40, 44, 48, 52, 56, 60, 64]
NUM_LAYERS = len(DIMS) - 1     # 14 original Linear layers
FUSE_AT = 6                    # Linear(40,36) (no ReLU) fused with Linear(36,40)
NUM_FUSED = NUM_LAYERS - 1     # 13 layers after fusion; ReLU after all but last
PAD = 64                       # every feature dim fits in 64 (sublane axis)
LANE = 128                     # lane granularity for unmasked stores
MAX_TILE_B = 512               # batch-lane tile (multiple of 256 for v6e/v7x MXU)


def _round_up(n, m):
    return ((n + m - 1) // m) * m


def _choose_tiling(batch):
    """Pick (b_pad, tile_b): lane-aligned, minimal padding waste, >=2 tiles
    when the batch allows it (so v7x's dual TensorCores split the work)."""
    b128 = _round_up(max(batch, 1), LANE)
    if b128 // LANE == 1:
        return b128, b128
    best = None
    for chunks in range(1, MAX_TILE_B // LANE + 1):
        tile_b = chunks * LANE
        b_pad = _round_up(b128, tile_b)
        if b_pad // tile_b < 2:          # keep at least 2 grid tiles
            continue
        key = (b_pad - b128, -tile_b)    # minimize waste, then maximize tile
        if best is None or key < best[0]:
            best = (key, b_pad, tile_b)
    if best is None:
        return b128, b128
    return best[1], best[2]


def autoencoder_kernel(x_ref, w_ref, b_ref, o_ref):
    # Feature-major layout, batch in lanes:
    #   x_ref: (64, TILE_B) f32    w_ref: (13, 64, 64) bf16  (W^T, zero-padded)
    #   b_ref: (13, 64, 1)  f32    o_ref: (64, TILE_B) f32
    h = x_ref[...].astype(jnp.bfloat16)
    for l in range(NUM_FUSED):                       # static 13-layer unroll
        acc = jnp.dot(w_ref[l], h,                   # (64,64)x(64,TILE_B) on MXU
                      preferred_element_type=jnp.float32) + b_ref[l]
        if l < NUM_FUSED - 1:
            h = jnp.maximum(acc, 0.0).astype(jnp.bfloat16)   # ReLU in f32, carry bf16
        else:
            o_ref[...] = acc                         # lane-dense unmasked store


@jax.jit
def autoencoder_forward(x, w_stack, b_stack):
    B = x.shape[0]
    b_pad, tile_b = _choose_tiling(B)
    num_tiles = b_pad // tile_b

    # Layout plumbing in the wrapper: batch -> lanes, pad batch to tile multiple.
    x_t = jnp.pad(x.T.astype(jnp.float32), ((0, 0), (0, b_pad - B)))

    flops = 2 * NUM_FUSED * PAD * PAD * b_pad
    bytes_accessed = (b_pad * PAD * 4 * 2            # activations in + out (f32)
                      + NUM_FUSED * PAD * PAD * 2    # bf16 weights
                      + NUM_FUSED * PAD * 4)         # f32 biases

    out_t = pl.pallas_call(
        autoencoder_kernel,
        out_shape=jax.ShapeDtypeStruct((PAD, b_pad), jnp.float32),
        grid_spec=pltpu.PrefetchScalarGridSpec(
            num_scalar_prefetch=0,
            grid=(num_tiles,),
            in_specs=[
                pl.BlockSpec((PAD, tile_b), lambda i: (0, i)),
                # constant index_maps -> weight/bias slabs stay VMEM-resident
                pl.BlockSpec((NUM_FUSED, PAD, PAD), lambda i: (0, 0, 0)),
                pl.BlockSpec((NUM_FUSED, PAD, 1), lambda i: (0, 0, 0)),
            ],
            out_specs=pl.BlockSpec((PAD, tile_b), lambda i: (0, i)),
        ),
        compiler_params=pltpu.CompilerParams(
            dimension_semantics=("parallel",)),
        cost_estimate=pl.CostEstimate(
            flops=flops, transcendentals=0, bytes_accessed=bytes_accessed),
    )(x_t, w_stack, b_stack)

    return out_t[:, :B].T


def init_params(key):
    """Per-layer f32 params mimicking PyTorch Linear default U(-1/sqrt(fan_in), ..)."""
    params = []
    for l in range(NUM_LAYERS):
        d_in, d_out = DIMS[l], DIMS[l + 1]
        key, kw, kb = jax.random.split(key, 3)
        bound = 1.0 / (d_in ** 0.5)
        W = jax.random.uniform(kw, (d_in, d_out), jnp.float32, -bound, bound)
        b = jax.random.uniform(kb, (d_out,), jnp.float32, -bound, bound)
        params.append((W, b))
    return params


def pack_params(params):
    """Fuse the no-ReLU layer pair, transpose, zero-pad into (13,64,64) bf16 +
    (13,64,1) f32 slabs for the feature-major kernel. Zero padding is exact
    through bias-add and ReLU."""
    fused = []
    l = 0
    while l < NUM_LAYERS:
        if l == FUSE_AT:
            W6, b6 = params[l]
            W7, b7 = params[l + 1]
            fused.append((W6 @ W7, b6 @ W7 + b7))    # Linear(40,40), ReLU follows
            l += 2
        else:
            fused.append(params[l])
            l += 1
    assert len(fused) == NUM_FUSED

    w_stack = jnp.zeros((NUM_FUSED, PAD, PAD), jnp.float32)
    b_stack = jnp.zeros((NUM_FUSED, PAD, 1), jnp.float32)
    for i, (W, b) in enumerate(fused):
        d_in, d_out = W.shape
        w_stack = w_stack.at[i, :d_out, :d_in].set(W.T)   # store W^T (feature-major)
        b_stack = b_stack.at[i, :d_out, 0].set(b)
    return w_stack.astype(jnp.bfloat16), b_stack


def reference_forward_f32(x, params):
    """Pure f32, un-fused chain — exactly the PyTorch module semantics."""
    h = x
    for l, (W, b) in enumerate(params):
        h = h @ W + b
        if l not in (6, 13):
            h = jnp.maximum(h, 0.0)
    return h


def reference_forward_packed(x, w_stack, b_stack):
    """Mirrors the kernel's math (fused layers, bf16 weights/activations, f32 acc)."""
    h = x.T.astype(jnp.bfloat16)
    out = None
    for l in range(NUM_FUSED):
        acc = jnp.dot(w_stack[l], h, preferred_element_type=jnp.float32) + b_stack[l]
        if l < NUM_FUSED - 1:
            h = jnp.maximum(acc, 0.0).astype(jnp.bfloat16)
        else:
            out = acc
    return out.T


if __name__ == "__main__":
    key = jax.random.PRNGKey(0)
    key, kx = jax.random.split(key)
    B = 8
    x = jax.random.normal(kx, (B, 64), dtype=jnp.float32)

    params = init_params(key)
    w_stack, b_stack = pack_params(params)

    out = jax.block_until_ready(autoencoder_forward(x, w_stack, b_stack))
    assert out.shape == (B, 64)

    # Tight check: kernel vs. a reference with identical (fused / bf16) math.
    ref_packed = reference_forward_packed(x, w_stack, b_stack)
    assert jnp.allclose(out, ref_packed, atol=2e-3, rtol=2e-3), "mismatch vs packed ref"

    # Looser check: kernel vs. the exact f32 PyTorch-style forward (bf16 rounding).
    ref_f32 = reference_forward_f32(x, params)
    assert jnp.allclose(out, ref_f32, atol=5e-2, rtol=5e-2), "mismatch vs f32 ref"

    print("KERNEL_OK")
</pallas_src>

<mosaic_0001>
module attributes {stable_mosaic.version = 11 : i64} {
  func.func @autoencoder_kernel(%arg0: i32, %arg1: memref<64x128xf32, #tpu.memory_space<vmem>>, %arg2: memref<13x64x64xbf16, #tpu.memory_space<vmem>>, %arg3: memref<13x64x1xf32, #tpu.memory_space<vmem>>, %arg4: memref<64x128xf32, #tpu.memory_space<vmem>>) attributes {dimension_semantics = [#tpu.dimension_semantics<parallel>], iteration_bounds = array<i64: 1>, scalar_prefetch = 0 : i64, scratch_operands = 0 : i64, tpu.core_type = #tpu.core_type<tc>, window_params = [{transform_indices = @transform_0, window_bounds = array<i64: 64, 128>}, {pipeline_mode = #tpu.pipeline_mode<synchronous>, transform_indices = @transform_1, window_bounds = array<i64: 13, 64, 64>}, {pipeline_mode = #tpu.pipeline_mode<synchronous>, transform_indices = @transform_2, window_bounds = array<i64: 13, 64, 1>}, {transform_indices = @transform_3, window_bounds = array<i64: 64, 128>}]} {
    %c0 = arith.constant 0 : index
    %c0_0 = arith.constant 0 : index
    %0 = vector.load %arg1[%c0, %c0_0] : memref<64x128xf32, #tpu.memory_space<vmem>>, vector<64x128xf32>
    %1 = arith.truncf %0 : vector<64x128xf32> to vector<64x128xbf16>
    %c0_1 = arith.constant 0 : index
    %c0_2 = arith.constant 0 : index
    %c0_3 = arith.constant 0 : index
    %2 = vector.load %arg2[%c0_1, %c0_2, %c0_3] : memref<13x64x64xbf16, #tpu.memory_space<vmem>>, vector<1x64x64xbf16>
    %3 = vector.shape_cast %2 : vector<1x64x64xbf16> to vector<64x64xbf16>
    %cst = arith.constant dense<0.000000e+00> : vector<64x128xf32>
    %4 = tpu.matmul %3, %1, %cst {dimension_numbers = #tpu.dot_dimension_numbers<[1], [0], [0], [1], [0, 0, 1, 1], [], []>} : vector<64x64xbf16>, vector<64x128xbf16>, vector<64x128xf32> -> vector<64x128xf32>
    %c0_4 = arith.constant 0 : index
    %c0_5 = arith.constant 0 : index
    %c0_6 = arith.constant 0 : index
    %5 = vector.load %arg3[%c0_4, %c0_5, %c0_6] : memref<13x64x1xf32, #tpu.memory_space<vmem>>, vector<1x64x1xf32>
    %6 = vector.shape_cast %5 : vector<1x64x1xf32> to vector<64x1xf32>
    %7 = vector.broadcast %6 : vector<64x1xf32> to vector<64x128xf32>
    %8 = arith.addf %4, %7 : vector<64x128xf32>
    %cst_7 = arith.constant 0.000000e+00 : f32
    %9 = vector.broadcast %cst_7 : f32 to vector<64x128xf32>
    %10 = arith.maximumf %8, %9 : vector<64x128xf32>
    %11 = arith.truncf %10 : vector<64x128xf32> to vector<64x128xbf16>
    %c1 = arith.constant 1 : index
    %c0_8 = arith.constant 0 : index
    %c0_9 = arith.constant 0 : index
    %12 = vector.load %arg2[%c1, %c0_8, %c0_9] : memref<13x64x64xbf16, #tpu.memory_space<vmem>>, vector<1x64x64xbf16>
    %13 = vector.shape_cast %12 : vector<1x64x64xbf16> to vector<64x64xbf16>
    %cst_10 = arith.constant dense<0.000000e+00> : vector<64x128xf32>
    %14 = tpu.matmul %13, %11, %cst_10 {dimension_numbers = #tpu.dot_dimension_numbers<[1], [0], [0], [1], [0, 0, 1, 1], [], []>} : vector<64x64xbf16>, vector<64x128xbf16>, vector<64x128xf32> -> vector<64x128xf32>
    %c1_11 = arith.constant 1 : index
    %c0_12 = arith.constant 0 : index
    %c0_13 = arith.constant 0 : index
    %15 = vector.load %arg3[%c1_11, %c0_12, %c0_13] : memref<13x64x1xf32, #tpu.memory_space<vmem>>, vector<1x64x1xf32>
    %16 = vector.shape_cast %15 : vector<1x64x1xf32> to vector<64x1xf32>
    %17 = vector.broadcast %16 : vector<64x1xf32> to vector<64x128xf32>
    %18 = arith.addf %14, %17 : vector<64x128xf32>
    %cst_14 = arith.constant 0.000000e+00 : f32
    %19 = vector.broadcast %cst_14 : f32 to vector<64x128xf32>
    %20 = arith.maximumf %18, %19 : vector<64x128xf32>
    %21 = arith.truncf %20 : vector<64x128xf32> to vector<64x128xbf16>
    %c2 = arith.constant 2 : index
    %c0_15 = arith.constant 0 : index
    %c0_16 = arith.constant 0 : index
    %22 = vector.load %arg2[%c2, %c0_15, %c0_16] : memref<13x64x64xbf16, #tpu.memory_space<vmem>>, vector<1x64x64xbf16>
    %23 = vector.shape_cast %22 : vector<1x64x64xbf16> to vector<64x64xbf16>
    %cst_17 = arith.constant dense<0.000000e+00> : vector<64x128xf32>
    %24 = tpu.matmul %23, %21, %cst_17 {dimension_numbers = #tpu.dot_dimension_numbers<[1], [0], [0], [1], [0, 0, 1, 1], [], []>} : vector<64x64xbf16>, vector<64x128xbf16>, vector<64x128xf32> -> vector<64x128xf32>
    %c2_18 = arith.constant 2 : index
    %c0_19 = arith.constant 0 : index
    %c0_20 = arith.constant 0 : index
    %25 = vector.load %arg3[%c2_18, %c0_19, %c0_20] : memref<13x64x1xf32, #tpu.memory_space<vmem>>, vector<1x64x1xf32>
    %26 = vector.shape_cast %25 : vector<1x64x1xf32> to vector<64x1xf32>
    %27 = vector.broadcast %26 : vector<64x1xf32> to vector<64x128xf32>
    %28 = arith.addf %24, %27 : vector<64x128xf32>
    %cst_21 = arith.constant 0.000000e+00 : f32
    %29 = vector.broadcast %cst_21 : f32 to vector<64x128xf32>
    %30 = arith.maximumf %28, %29 : vector<64x128xf32>
    %31 = arith.truncf %30 : vector<64x128xf32> to vector<64x128xbf16>
    %c3 = arith.constant 3 : index
    %c0_22 = arith.constant 0 : index
    %c0_23 = arith.constant 0 : index
    %32 = vector.load %arg2[%c3, %c0_22, %c0_23] : memref<13x64x64xbf16, #tpu.memory_space<vmem>>, vector<1x64x64xbf16>
    %33 = vector.shape_cast %32 : vector<1x64x64xbf16> to vector<64x64xbf16>
    %cst_24 = arith.constant dense<0.000000e+00> : vector<64x128xf32>
    %34 = tpu.matmul %33, %31, %cst_24 {dimension_numbers = #tpu.dot_dimension_numbers<[1], [0], [0], [1], [0, 0, 1, 1], [], []>} : vector<64x64xbf16>, vector<64x128xbf16>, vector<64x128xf32> -> vector<64x128xf32>
    %c3_25 = arith.constant 3 : index
    %c0_26 = arith.constant 0 : index
    %c0_27 = arith.constant 0 : index
    %35 = vector.load %arg3[%c3_25, %c0_26, %c0_27] : memref<13x64x1xf32, #tpu.memory_space<vmem>>, vector<1x64x1xf32>
    %36 = vector.shape_cast %35 : vector<1x64x1xf32> to vector<64x1xf32>
    %37 = vector.broadcast %36 : vector<64x1xf32> to vector<64x128xf32>
    %38 = arith.addf %34, %37 : vector<64x128xf32>
    %cst_28 = arith.constant 0.000000e+00 : f32
    %39 = vector.broadcast %cst_28 : f32 to vector<64x128xf32>
    %40 = arith.maximumf %38, %39 : vector<64x128xf32>
    %41 = arith.truncf %40 : vector<64x128xf32> to vector<64x128xbf16>
    %c4 = arith.constant 4 : index
    %c0_29 = arith.constant 0 : index
    %c0_30 = arith.constant 0 : index
    %42 = vector.load %arg2[%c4, %c0_29, %c0_30] : memref<13x64x64xbf16, #tpu.memory_space<vmem>>, vector<1x64x64xbf16>
    %43 = vector.shape_cast %42 : vector<1x64x64xbf16> to vector<64x64xbf16>
    %cst_31 = arith.constant dense<0.000000e+00> : vector<64x128xf32>
    %44 = tpu.matmul %43, %41, %cst_31 {dimension_numbers = #tpu.dot_dimension_numbers<[1], [0], [0], [1], [0, 0, 1, 1], [], []>} : vector<64x64xbf16>, vector<64x128xbf16>, vector<64x128xf32> -> vector<64x128xf32>
    %c4_32 = arith.constant 4 : index
    %c0_33 = arith.constant 0 : index
    %c0_34 = arith.constant 0 : index
    %45 = vector.load %arg3[%c4_32, %c0_33, %c0_34] : memref<13x64x1xf32, #tpu.memory_space<vmem>>, vector<1x64x1xf32>
    %46 = vector.shape_cast %45 : vector<1x64x1xf32> to vector<64x1xf32>
    %47 = vector.broadcast %46 : vector<64x1xf32> to vector<64x128xf32>
    %48 = arith.addf %44, %47 : vector<64x128xf32>
    %cst_35 = arith.constant 0.000000e+00 : f32
    %49 = vector.broadcast %cst_35 : f32 to vector<64x128xf32>
    %50 = arith.maximumf %48, %49 : vector<64x128xf32>
    %51 = arith.truncf %50 : vector<64x128xf32> to vector<64x128xbf16>
    %c5 = arith.constant 5 : index
    %c0_36 = arith.constant 0 : index
    %c0_37 = arith.constant 0 : index
    %52 = vector.load %arg2[%c5, %c0_36, %c0_37] : memref<13x64x64xbf16, #tpu.memory_space<vmem>>, vector<1x64x64xbf16>
    %53 = vector.shape_cast %52 : vector<1x64x64xbf16> to vector<64x64xbf16>
    %cst_38 = arith.constant dense<0.000000e+00> : vector<64x128xf32>
    %54 = tpu.matmul %53, %51, %cst_38 {dimension_numbers = #tpu.dot_dimension_numbers<[1], [0], [0], [1], [0, 0, 1, 1], [], []>} : vector<64x64xbf16>, vector<64x128xbf16>, vector<64x128xf32> -> vector<64x128xf32>
    %c5_39 = arith.constant 5 : index
    %c0_40 = arith.constant 0 : index
    %c0_41 = arith.constant 0 : index
    %55 = vector.load %arg3[%c5_39, %c0_40, %c0_41] : memref<13x64x1xf32, #tpu.memory_space<vmem>>, vector<1x64x1xf32>
    %56 = vector.shape_cast %55 : vector<1x64x1xf32> to vector<64x1xf32>
    %57 = vector.broadcast %56 : vector<64x1xf32> to vector<64x128xf32>
    %58 = arith.addf %54, %57 : vector<64x128xf32>
    %cst_42 = arith.constant 0.000000e+00 : f32
    %59 = vector.broadcast %cst_42 : f32 to vector<64x128xf32>
    %60 = arith.maximumf %58, %59 : vector<64x128xf32>
    %61 = arith.truncf %60 : vector<64x128xf32> to vector<64x128xbf16>
    %c6 = arith.constant 6 : index
    %c0_43 = arith.constant 0 : index
    %c0_44 = arith.constant 0 : index
    %62 = vector.load %arg2[%c6, %c0_43, %c0_44] : memref<13x64x64xbf16, #tpu.memory_space<vmem>>, vector<1x64x64xbf16>
    %63 = vector.shape_cast %62 : vector<1x64x64xbf16> to vector<64x64xbf16>
    %cst_45 = arith.constant dense<0.000000e+00> : vector<64x128xf32>
    %64 = tpu.matmul %63, %61, %cst_45 {dimension_numbers = #tpu.dot_dimension_numbers<[1], [0], [0], [1], [0, 0, 1, 1], [], []>} : vector<64x64xbf16>, vector<64x128xbf16>, vector<64x128xf32> -> vector<64x128xf32>
    %c6_46 = arith.constant 6 : index
    %c0_47 = arith.constant 0 : index
    %c0_48 = arith.constant 0 : index
    %65 = vector.load %arg3[%c6_46, %c0_47, %c0_48] : memref<13x64x1xf32, #tpu.memory_space<vmem>>, vector<1x64x1xf32>
    %66 = vector.shape_cast %65 : vector<1x64x1xf32> to vector<64x1xf32>
    %67 = vector.broadcast %66 : vector<64x1xf32> to vector<64x128xf32>
    %68 = arith.addf %64, %67 : vector<64x128xf32>
    %cst_49 = arith.constant 0.000000e+00 : f32
    %69 = vector.broadcast %cst_49 : f32 to vector<64x128xf32>
    %70 = arith.maximumf %68, %69 : vector<64x128xf32>
    %71 = arith.truncf %70 : vector<64x128xf32> to vector<64x128xbf16>
    %c7 = arith.constant 7 : index
    %c0_50 = arith.constant 0 : index
    %c0_51 = arith.constant 0 : index
    %72 = vector.load %arg2[%c7, %c0_50, %c0_51] : memref<13x64x64xbf16, #tpu.memory_space<vmem>>, vector<1x64x64xbf16>
    %73 = vector.shape_cast %72 : vector<1x64x64xbf16> to vector<64x64xbf16>
    %cst_52 = arith.constant dense<0.000000e+00> : vector<64x128xf32>
    %74 = tpu.matmul %73, %71, %cst_52 {dimension_numbers = #tpu.dot_dimension_numbers<[1], [0], [0], [1], [0, 0, 1, 1], [], []>} : vector<64x64xbf16>, vector<64x128xbf16>, vector<64x128xf32> -> vector<64x128xf32>
    %c7_53 = arith.constant 7 : index
    %c0_54 = arith.constant 0 : index
    %c0_55 = arith.constant 0 : index
    %75 = vector.load %arg3[%c7_53, %c0_54, %c0_55] : memref<13x64x1xf32, #tpu.memory_space<vmem>>, vector<1x64x1xf32>
    %76 = vector.shape_cast %75 : vector<1x64x1xf32> to vector<64x1xf32>
    %77 = vector.broadcast %76 : vector<64x1xf32> to vector<64x128xf32>
    %78 = arith.addf %74, %77 : vector<64x128xf32>
    %cst_56 = arith.constant 0.000000e+00 : f32
    %79 = vector.broadcast %cst_56 : f32 to vector<64x128xf32>
    %80 = arith.maximumf %78, %79 : vector<64x128xf32>
    %81 = arith.truncf %80 : vector<64x128xf32> to vector<64x128xbf16>
    %c8 = arith.constant 8 : index
    %c0_57 = arith.constant 0 : index
    %c0_58 = arith.constant 0 : index
    %82 = vector.load %arg2[%c8, %c0_57, %c0_58] : memref<13x64x64xbf16, #tpu.memory_space<vmem>>, vector<1x64x64xbf16>
    %83 = vector.shape_cast %82 : vector<1x64x64xbf16> to vector<64x64xbf16>
    %cst_59 = arith.constant dense<0.000000e+00> : vector<64x128xf32>
    %84 = tpu.matmul %83, %81, %cst_59 {dimension_numbers = #tpu.dot_dimension_numbers<[1], [0], [0], [1], [0, 0, 1, 1], [], []>} : vector<64x64xbf16>, vector<64x128xbf16>, vector<64x128xf32> -> vector<64x128xf32>
    %c8_60 = arith.constant 8 : index
    %c0_61 = arith.constant 0 : index
    %c0_62 = arith.constant 0 : index
    %85 = vector.load %arg3[%c8_60, %c0_61, %c0_62] : memref<13x64x1xf32, #tpu.memory_space<vmem>>, vector<1x64x1xf32>
    %86 = vector.shape_cast %85 : vector<1x64x1xf32> to vector<64x1xf32>
    %87 = vector.broadcast %86 : vector<64x1xf32> to vector<64x128xf32>
    %88 = arith.addf %84, %87 : vector<64x128xf32>
    %cst_63 = arith.constant 0.000000e+00 : f32
    %89 = vector.broadcast %cst_63 : f32 to vector<64x128xf32>
    %90 = arith.maximumf %88, %89 : vector<64x128xf32>
    %91 = arith.truncf %90 : vector<64x128xf32> to vector<64x128xbf16>
    %c9 = arith.constant 9 : index
    %c0_64 = arith.constant 0 : index
    %c0_65 = arith.constant 0 : index
    %92 = vector.load %arg2[%c9, %c0_64, %c0_65] : memref<13x64x64xbf16, #tpu.memory_space<vmem>>, vector<1x64x64xbf16>
    %93 = vector.shape_cast %92 : vector<1x64x64xbf16> to vector<64x64xbf16>
    %cst_66 = arith.constant dense<0.000000e+00> : vector<64x128xf32>
    %94 = tpu.matmul %93, %91, %cst_66 {dimension_numbers = #tpu.dot_dimension_numbers<[1], [0], [0], [1], [0, 0, 1, 1], [], []>} : vector<64x64xbf16>, vector<64x128xbf16>, vector<64x128xf32> -> vector<64x128xf32>
    %c9_67 = arith.constant 9 : index
    %c0_68 = arith.constant 0 : index
    %c0_69 = arith.constant 0 : index
    %95 = vector.load %arg3[%c9_67, %c0_68, %c0_69] : memref<13x64x1xf32, #tpu.memory_space<vmem>>, vector<1x64x1xf32>
    %96 = vector.shape_cast %95 : vector<1x64x1xf32> to vector<64x1xf32>
    %97 = vector.broadcast %96 : vector<64x1xf32> to vector<64x128xf32>
    %98 = arith.addf %94, %97 : vector<64x128xf32>
    %cst_70 = arith.constant 0.000000e+00 : f32
    %99 = vector.broadcast %cst_70 : f32 to vector<64x128xf32>
    %100 = arith.maximumf %98, %99 : vector<64x128xf32>
    %101 = arith.truncf %100 : vector<64x128xf32> to vector<64x128xbf16>
    %c10 = arith.constant 10 : index
    %c0_71 = arith.constant 0 : index
    %c0_72 = arith.constant 0 : index
    %102 = vector.load %arg2[%c10, %c0_71, %c0_72] : memref<13x64x64xbf16, #tpu.memory_space<vmem>>, vector<1x64x64xbf16>
    %103 = vector.shape_cast %102 : vector<1x64x64xbf16> to vector<64x64xbf16>
    %cst_73 = arith.constant dense<0.000000e+00> : vector<64x128xf32>
    %104 = tpu.matmul %103, %101, %cst_73 {dimension_numbers = #tpu.dot_dimension_numbers<[1], [0], [0], [1], [0, 0, 1, 1], [], []>} : vector<64x64xbf16>, vector<64x128xbf16>, vector<64x128xf32> -> vector<64x128xf32>
    %c10_74 = arith.constant 10 : index
    %c0_75 = arith.constant 0 : index
    %c0_76 = arith.constant 0 : index
    %105 = vector.load %arg3[%c10_74, %c0_75, %c0_76] : memref<13x64x1xf32, #tpu.memory_space<vmem>>, vector<1x64x1xf32>
    %106 = vector.shape_cast %105 : vector<1x64x1xf32> to vector<64x1xf32>
    %107 = vector.broadcast %106 : vector<64x1xf32> to vector<64x128xf32>
    %108 = arith.addf %104, %107 : vector<64x128xf32>
    %cst_77 = arith.constant 0.000000e+00 : f32
    %109 = vector.broadcast %cst_77 : f32 to vector<64x128xf32>
    %110 = arith.maximumf %108, %109 : vector<64x128xf32>
    %111 = arith.truncf %110 : vector<64x128xf32> to vector<64x128xbf16>
    %c11 = arith.constant 11 : index
    %c0_78 = arith.constant 0 : index
    %c0_79 = arith.constant 0 : index
    %112 = vector.load %arg2[%c11, %c0_78, %c0_79] : memref<13x64x64xbf16, #tpu.memory_space<vmem>>, vector<1x64x64xbf16>
    %113 = vector.shape_cast %112 : vector<1x64x64xbf16> to vector<64x64xbf16>
    %cst_80 = arith.constant dense<0.000000e+00> : vector<64x128xf32>
    %114 = tpu.matmul %113, %111, %cst_80 {dimension_numbers = #tpu.dot_dimension_numbers<[1], [0], [0], [1], [0, 0, 1, 1], [], []>} : vector<64x64xbf16>, vector<64x128xbf16>, vector<64x128xf32> -> vector<64x128xf32>
    %c11_81 = arith.constant 11 : index
    %c0_82 = arith.constant 0 : index
    %c0_83 = arith.constant 0 : index
    %115 = vector.load %arg3[%c11_81, %c0_82, %c0_83] : memref<13x64x1xf32, #tpu.memory_space<vmem>>, vector<1x64x1xf32>
    %116 = vector.shape_cast %115 : vector<1x64x1xf32> to vector<64x1xf32>
    %117 = vector.broadcast %116 : vector<64x1xf32> to vector<64x128xf32>
    %118 = arith.addf %114, %117 : vector<64x128xf32>
    %cst_84 = arith.constant 0.000000e+00 : f32
    %119 = vector.broadcast %cst_84 : f32 to vector<64x128xf32>
    %120 = arith.maximumf %118, %119 : vector<64x128xf32>
    %121 = arith.truncf %120 : vector<64x128xf32> to vector<64x128xbf16>
    %c12 = arith.constant 12 : index
    %c0_85 = arith.constant 0 : index
    %c0_86 = arith.constant 0 : index
    %122 = vector.load %arg2[%c12, %c0_85, %c0_86] : memref<13x64x64xbf16, #tpu.memory_space<vmem>>, vector<1x64x64xbf16>
    %123 = vector.shape_cast %122 : vector<1x64x64xbf16> to vector<64x64xbf16>
    %cst_87 = arith.constant dense<0.000000e+00> : vector<64x128xf32>
    %124 = tpu.matmul %123, %121, %cst_87 {dimension_numbers = #tpu.dot_dimension_numbers<[1], [0], [0], [1], [0, 0, 1, 1], [], []>} : vector<64x64xbf16>, vector<64x128xbf16>, vector<64x128xf32> -> vector<64x128xf32>
    %c12_88 = arith.constant 12 : index
    %c0_89 = arith.constant 0 : index
    %c0_90 = arith.constant 0 : index
    %125 = vector.load %arg3[%c12_88, %c0_89, %c0_90] : memref<13x64x1xf32, #tpu.memory_space<vmem>>, vector<1x64x1xf32>
    %126 = vector.shape_cast %125 : vector<1x64x1xf32> to vector<64x1xf32>
    %127 = vector.broadcast %126 : vector<64x1xf32> to vector<64x128xf32>
    %128 = arith.addf %124, %127 : vector<64x128xf32>
    %c0_91 = arith.constant 0 : index
    %c0_92 = arith.constant 0 : index
    %129 = vector.load %arg4[%c0_91, %c0_92] : memref<64x128xf32, #tpu.memory_space<vmem>>, vector<64x128xf32>
    tpu.vector_store %arg4[%c0_91, %c0_92], %128 {strides = array<i32>} : memref<64x128xf32, #tpu.memory_space<vmem>>, vector<64x128xf32>,
    return
  }
  func.func @transform_0(%arg0: i32) -> (i32, i32) {
    %c0_i32 = arith.constant 0 : i32
    %c0_i32_0 = arith.constant 0 : i32
    return %c0_i32, %arg0 : i32, i32
  }
  func.func @transform_1(%arg0: i32) -> (i32, i32, i32) {
    %c0_i32 = arith.constant 0 : i32
    %c0_i32_0 = arith.constant 0 : i32
    %c0_i32_1 = arith.constant 0 : i32
    %c0_i32_2 = arith.constant 0 : i32
    return %c0_i32, %c0_i32_0, %c0_i32_1 : i32, i32, i32
  }
  func.func @transform_2(%arg0: i32) -> (i32, i32, i32) {
    %c0_i32 = arith.constant 0 : i32
    %c0_i32_0 = arith.constant 0 : i32
    %c0_i32_1 = arith.constant 0 : i32
    %c0_i32_2 = arith.constant 0 : i32
    return %c0_i32, %c0_i32_0, %c0_i32_1 : i32, i32, i32
  }
  func.func @transform_3(%arg0: i32) -> (i32, i32) {
    %c0_i32 = arith.constant 0 : i32
    %c0_i32_0 = arith.constant 0 : i32
    return %c0_i32, %arg0 : i32, i32
  }
}

</mosaic_0001>

<bundles_post_ra>
// kernel: autoencoder_forward.1
= control target key start
LH: loop header
LB: loop body
LE: loop exit
PB: predicated region body
PF: predicated region fallthrough
CT: control target
= control target key end

     0   :  { %v2868_v0 = vmov 0   ;;  %vm103_vm0 = vcmask 523264   ;;  %s3457_s2 = inlined_call_operand.vmem [shape: f32[13,64,1], index: 2, kind: input, shape index: {}]   ;;  %s3458_s0 = inlined_call_operand.vmem [shape: f32[64,128], index: 0, kind: input, shape index: {}]   ;;  %s3459_s1 = inlined_call_operand.vmem [shape: bf16[13,64,64], index: 1, kind: input, shape index: {}]   ;;  %s3460_s3 = inlined_call_operand.vmem [shape: f32[64,128], index: 3, kind: output, shape index: {}]  }
   0x1   :  { %2815 = vset.pattern.permute.xlu1 %v2868_v0  ;;  %2814 = vset.pattern.permute.xlu0 %v2868_v0  ;;  %v37_v1 = vld [vmem:[%s3457_s2 + $0x10] sm:$0xff]  ;;  %v35_v2 = vld [vmem:[%s3457_s2] sm:$0xff]  ;;  %v16_v4 = vld [vmem:[%s3458_s0 + $0x8] sm:$0xff] }
   0x2   :  { %v15_v3 = vld [vmem:[%s3458_s0] sm:$0xff]  ;;  %55 = vperm.xlu1 %2815, %v37_v1   ;;  %45 = vperm.xlu0 %2814, %v35_v2   ;;  %v38_v6 = vld [vmem:[%s3457_s2 + $0x18] sm:$0xff]  ;;  %v17_v7 = vld [vmem:[%s3458_s0 + $0x10] sm:$0xff] }
   0x3   :  { %v23_v5 = vpack.c.bf16 %v16_v4, %v15_v3  ;;  %v18_v8 = vld [vmem:[%s3458_s0 + $0x18] sm:$0xff]  ;;  %v36_v9 = vld [vmem:[%s3457_s2 + $0x8] sm:$0xff]  ;;  %v19_v11 = vld [vmem:[%s3458_s0 + $0x20] sm:$0xff] }
   0x4   :  { %v24_v10 = vpack.c.bf16 %v18_v8, %v17_v7  ;;  %v20_v12 = vld [vmem:[%s3458_s0 + $0x28] sm:$0xff]  ;;  %v39_v14 = vld [vmem:[%s3457_s2 + $0x20] sm:$0xff]  ;;  %v21_v15 = vld [vmem:[%s3458_s0 + $0x30] sm:$0xff] }
   0x5   :  { %2597 = vmatprep.subr.bf16.mxu0 %v23_v5  ;;  %v40_v13 = vld [vmem:[%s3457_s2 + $0x28] sm:$0xff]  ;;  %v25_v16 = vpack.c.bf16 %v20_v12, %v19_v11  ;;  %v2816_v17 = vld [vmem:[%s3459_s1] sm:$0xff]   ;;  %v22_v18 = vld [vmem:[%s3458_s0 + $0x38] sm:$0xff] }
   0x6   :  { %2598 = vmatpush3.bf16.msra.mxu0 %v23_v5  ;;  %60 = vperm.xlu1 %2815, %v38_v6   ;;  %v42_v19 = vld [vmem:[%s3457_s2 + $0x38] sm:$0xff]  ;;  %v26_v20 = vpack.c.bf16 %v22_v18, %v21_v15  ;;  %v41_v21 = vld [vmem:[%s3457_s2 + $0x30] sm:$0xff]  ;;  %v2214_v22 = vld [vmem:[%s3457_s2 + $0x48] sm:$0xff] }
   0x7   :  { %50 = vperm.xlu0 %2814, %v36_v9   ;;  %2599 = vmatprep.subr.bf16.mxu0 %v24_v10  ;;  %v2213_v23 = vld [vmem:[%s3457_s2 + $0x40] sm:$0xff]  ;;  %v2817_v24 = vld [vmem:[%s3459_s1 + $0x8] sm:$0xff]   ;;  %v2818_v25 = vld [vmem:[%s3459_s1 + $0x10] sm:$0xff]  }
   0x8   :  { %2605 = vmatprep.mubr.msk.bf16.mxu0 %vm103_vm0, %v2816_v17  ;;  %v2216_v26 = vld [vmem:[%s3457_s2 + $0x58] sm:$0xff]  ;;  %v2215_v27 = vld [vmem:[%s3457_s2 + $0x50] sm:$0xff]  ;;  %v2218_v28 = vld [vmem:[%s3457_s2 + $0x68] sm:$0xff] }
   0x9   :  { %v2217_v29 = vld [vmem:[%s3457_s2 + $0x60] sm:$0xff]  ;;  %v2819_v30 = vld [vmem:[%s3459_s1 + $0x18] sm:$0xff]   ;;  %v2219_v32 = vld [vmem:[%s3457_s2 + $0x70] sm:$0xff] }
   0xa   :  { %2600 = vmatpush3.bf16.msra.mxu0 %v24_v10  ;;  %70 = vperm.xlu1 %2815, %v40_v13   ;;  %v2220_v31 = vld [vmem:[%s3457_s2 + $0x78] sm:$0xff]  ;;  %v2238_v33 = vld [vmem:[%s3457_s2 + $0x88] sm:$0xff]  ;;  %v2237_v34 = vld [vmem:[%s3457_s2 + $0x80] sm:$0xff] }
   0xb   :  { %65 = vperm.xlu0 %2814, %v39_v14   ;;  %2601 = vmatprep.subr.bf16.mxu0 %v25_v16  ;;  %v2240_v35 = vld [vmem:[%s3457_s2 + $0x98] sm:$0xff]  ;;  %v2239_v36 = vld [vmem:[%s3457_s2 + $0x90] sm:$0xff]  ;;  %v2242_v37 = vld [vmem:[%s3457_s2 + $0xa8] sm:$0xff] }
   0xc   :  { %v2241_v38 = vld [vmem:[%s3457_s2 + $0xa0] sm:$0xff]  ;;  %v2244_v39 = vld [vmem:[%s3457_s2 + $0xb8] sm:$0xff]  ;;  %v2243_v40 = vld [vmem:[%s3457_s2 + $0xb0] sm:$0xff] }
   0xd   :  { %v2262_v41 = vld [vmem:[%s3457_s2 + $0xc8] sm:$0xff]  ;;  %v2261_v42 = vld [vmem:[%s3457_s2 + $0xc0] sm:$0xff]  ;;  %v2264_v43 = vld [vmem:[%s3457_s2 + $0xd8] sm:$0xff] }
   0xe   :  { %2602 = vmatpush3.bf16.msra.mxu0 %v25_v16  ;;  %80 = vperm.xlu1 %2815, %v42_v19   ;;  %v2263_v44 = vld [vmem:[%s3457_s2 + $0xd0] sm:$0xff]  ;;  %v2266_v45 = vld [vmem:[%s3457_s2 + $0xe8] sm:$0xff]  ;;  %v2265_v46 = vld [vmem:[%s3457_s2 + $0xe0] sm:$0xff] }
   0xf   :  { %75 = vperm.xlu0 %2814, %v41_v21   ;;  %2603 = vmatprep.subr.bf16.mxu0 %v26_v20  ;;  %v2268_v47 = vld [vmem:[%s3457_s2 + $0xf8] sm:$0xff]  ;;  %v2267_v48 = vld [vmem:[%s3457_s2 + $0xf0] sm:$0xff]  ;;  %v2286_v49 = vld [vmem:[%s3457_s2 + $0x108] sm:$0xff] }
  0x10   :  { %v2285_v50 = vld [vmem:[%s3457_s2 + $0x100] sm:$0xff]  ;;  %v2288_v51 = vld [vmem:[%s3457_s2 + $0x118] sm:$0xff]  ;;  %v2287_v52 = vld [vmem:[%s3457_s2 + $0x110] sm:$0xff] }
  0x11   :  { %v2290_v53 = vld [vmem:[%s3457_s2 + $0x128] sm:$0xff]  ;;  %v2289_v54 = vld [vmem:[%s3457_s2 + $0x120] sm:$0xff]  ;;  %v2292_v55 = vld [vmem:[%s3457_s2 + $0x138] sm:$0xff] }
  0x12   :  { %2604 = vmatpush3.bf16.msra.mxu0 %v26_v20  ;;  %218 = vperm.xlu1 %2815, %v2214_v22   ;;  %v2291_v56 = vld [vmem:[%s3457_s2 + $0x130] sm:$0xff]  ;;  %v2310_v57 = vld [vmem:[%s3457_s2 + $0x148] sm:$0xff]  ;;  %v2309_v58 = vld [vmem:[%s3457_s2 + $0x140] sm:$0xff] }
  0x13   :  { %213 = vperm.xlu0 %2814, %v2213_v23   ;;  %v2312_v59 = vld [vmem:[%s3457_s2 + $0x158] sm:$0xff]  ;;  %v2311_v60 = vld [vmem:[%s3457_s2 + $0x150] sm:$0xff]  ;;  %v2314_v61 = vld [vmem:[%s3457_s2 + $0x168] sm:$0xff] }
  0x14   :  { %v2313_v62 = vld [vmem:[%s3457_s2 + $0x160] sm:$0xff]  ;;  %v2316_v63 = vld [vmem:[%s3457_s2 + $0x178] sm:$0xff]  ;;  %v2315_v0 = vld [vmem:[%s3457_s2 + $0x170] sm:$0xff] }
  0x15   :  { %2606 = vmatmul.mubr.msk.bf16.vlgmr.msra.gmra.mrb[0].mxu0 %vm103_vm0, %v2817_v24  ;;  %v2334_v1 = vld [vmem:[%s3457_s2 + $0x188] sm:$0xff]  ;;  %v2333_v2 = vld [vmem:[%s3457_s2 + $0x180] sm:$0xff]  ;;  %v2336_v3 = vld [vmem:[%s3457_s2 + $0x198] sm:$0xff] }
  0x16   :  { %228 = vperm.xlu1 %2815, %v2216_v26   ;;  %2609 = vmatprep.mubr.msk.bf16.mxu0 %vm103_vm0, %v2818_v25  ;;  %v2335_v4 = vld [vmem:[%s3457_s2 + $0x190] sm:$0xff]  ;;  %v2338_v5 = vld [vmem:[%s3457_s2 + $0x1a8] sm:$0xff]  ;;  %v2337_v6 = vld [vmem:[%s3457_s2 + $0x1a0] sm:$0xff] }
  0x17   :  { %223 = vperm.xlu0 %2814, %v2215_v27   ;;  %v2340_v7 = vld [vmem:[%s3457_s2 + $0x1b8] sm:$0xff]  ;;  %v2339_v8 = vld [vmem:[%s3457_s2 + $0x1b0] sm:$0xff]  ;;  %v2358_v9 = vld [vmem:[%s3457_s2 + $0x1c8] sm:$0xff] }
  0x18   :  { %v2357_v10 = vld [vmem:[%s3457_s2 + $0x1c0] sm:$0xff]  ;;  %v2360_v11 = vld [vmem:[%s3457_s2 + $0x1d8] sm:$0xff]  ;;  %v2359_v12 = vld [vmem:[%s3457_s2 + $0x1d0] sm:$0xff] }
  0x19   :  { %v2362_v13 = vld [vmem:[%s3457_s2 + $0x1e8] sm:$0xff]  ;;  %v2361_v14 = vld [vmem:[%s3457_s2 + $0x1e0] sm:$0xff]  ;;  %v2364_v15 = vld [vmem:[%s3457_s2 + $0x1f8] sm:$0xff] }
  0x1a   :  { %238 = vperm.xlu1 %2815, %v2218_v28   ;;  %v2363_v16 = vld [vmem:[%s3457_s2 + $0x1f0] sm:$0xff]  ;;  %v2382_v17 = vld [vmem:[%s3457_s2 + $0x208] sm:$0xff]  ;;  %v2820_v18 = vld [vmem:[%s3459_s1 + $0x20] sm:$0xff]  }
  0x1b   :  { %233 = vperm.xlu0 %2814, %v2217_v29   ;;  %v2381_v19 = vld [vmem:[%s3457_s2 + $0x200] sm:$0xff]  ;;  %2621 = vmatprep.mubr.msk.bf16.mxu1 %vm103_vm0, %v2820_v18  ;;  %v2384_v20 = vld [vmem:[%s3457_s2 + $0x218] sm:$0xff]  ;;  %v2383_v21 = vld [vmem:[%s3457_s2 + $0x210] sm:$0xff] }
  0x1c   :  { %v2386_v22 = vld [vmem:[%s3457_s2 + $0x228] sm:$0xff]  ;;  %v2385_v23 = vld [vmem:[%s3457_s2 + $0x220] sm:$0xff]  ;;  %v2388_v24 = vld [vmem:[%s3457_s2 + $0x238] sm:$0xff] }
  0x1d   :  { %2610 = vmatmul.mubr.msk.bf16.gmra.mrb[4].mxu0 %vm103_vm0, %v2819_v30  ;;  %v2387_v25 = vld [vmem:[%s3457_s2 + $0x230] sm:$0xff]  ;;  %v2406_v26 = vld [vmem:[%s3457_s2 + $0x248] sm:$0xff]  ;;  %v2405_v27 = vld [vmem:[%s3457_s2 + $0x240] sm:$0xff] }
  0x1e   :  { %248 = vperm.xlu1 %2815, %v2220_v31   ;;  %v2408_v28 = vld [vmem:[%s3457_s2 + $0x258] sm:$0xff]  ;;  %v2407_v29 = vld [vmem:[%s3457_s2 + $0x250] sm:$0xff]  ;;  %v2410_v30 = vld [vmem:[%s3457_s2 + $0x268] sm:$0xff] }
  0x1f   :  { %243 = vperm.xlu0 %2814, %v2219_v32   ;;  %v2409_v31 = vld [vmem:[%s3457_s2 + $0x260] sm:$0xff]  ;;  %v2412_v32 = vld [vmem:[%s3457_s2 + $0x278] sm:$0xff] }
  0x22   :  { %385 = vperm.xlu1 %2815, %v2238_v33   ;;  %v2411_v33 = vld [vmem:[%s3457_s2 + $0x270] sm:$0xff] }
  0x23   :  { %380 = vperm.xlu0 %2814, %v2237_v34   ;;  %v2430_v34 = vld [vmem:[%s3457_s2 + $0x288] sm:$0xff] }
  0x26   :  { %395 = vperm.xlu1 %2815, %v2240_v35   ;;  %v2429_v35 = vld [vmem:[%s3457_s2 + $0x280] sm:$0xff] }
  0x27   :  { %390 = vperm.xlu0 %2814, %v2239_v36   ;;  %v2432_v36 = vld [vmem:[%s3457_s2 + $0x298] sm:$0xff] }
  0x2a   :  { %405 = vperm.xlu1 %2815, %v2242_v37   ;;  %v2431_v37 = vld [vmem:[%s3457_s2 + $0x290] sm:$0xff] }
  0x2b   :  { %400 = vperm.xlu0 %2814, %v2241_v38   ;;  %v2434_v38 = vld [vmem:[%s3457_s2 + $0x2a8] sm:$0xff] }
  0x2e   :  { %415 = vperm.xlu1 %2815, %v2244_v39   ;;  %v2433_v39 = vld [vmem:[%s3457_s2 + $0x2a0] sm:$0xff] }
  0x2f   :  { %410 = vperm.xlu0 %2814, %v2243_v40   ;;  %v2436_v40 = vld [vmem:[%s3457_s2 + $0x2b8] sm:$0xff] }
  0x32   :  { %552 = vperm.xlu1 %2815, %v2262_v41   ;;  %v2435_v41 = vld [vmem:[%s3457_s2 + $0x2b0] sm:$0xff] }
  0x33   :  { %547 = vperm.xlu0 %2814, %v2261_v42   ;;  %v2454_v42 = vld [vmem:[%s3457_s2 + $0x2c8] sm:$0xff] }
  0x36   :  { %562 = vperm.xlu1 %2815, %v2264_v43   ;;  %v2453_v43 = vld [vmem:[%s3457_s2 + $0x2c0] sm:$0xff] }
  0x37   :  { %557 = vperm.xlu0 %2814, %v2263_v44   ;;  %v2456_v44 = vld [vmem:[%s3457_s2 + $0x2d8] sm:$0xff] }
  0x3a   :  { %572 = vperm.xlu1 %2815, %v2266_v45   ;;  %v2455_v45 = vld [vmem:[%s3457_s2 + $0x2d0] sm:$0xff] }
  0x3b   :  { %567 = vperm.xlu0 %2814, %v2265_v46   ;;  %v2458_v46 = vld [vmem:[%s3457_s2 + $0x2e8] sm:$0xff] }
  0x3e   :  { %582 = vperm.xlu1 %2815, %v2268_v47   ;;  %v2457_v47 = vld [vmem:[%s3457_s2 + $0x2e0] sm:$0xff] }
  0x3f   :  { %577 = vperm.xlu0 %2814, %v2267_v48   ;;  %v2460_v48 = vld [vmem:[%s3457_s2 + $0x2f8] sm:$0xff] }
  0x42   :  { %719 = vperm.xlu1 %2815, %v2286_v49   ;;  %v2459_v49 = vld [vmem:[%s3457_s2 + $0x2f0] sm:$0xff] }
  0x43   :  { %714 = vperm.xlu0 %2814, %v2285_v50   ;;  %v2478_v50 = vld [vmem:[%s3457_s2 + $0x308] sm:$0xff] }
  0x46   :  { %729 = vperm.xlu1 %2815, %v2288_v51   ;;  %v2477_v51 = vld [vmem:[%s3457_s2 + $0x300] sm:$0xff] }
  0x47   :  { %724 = vperm.xlu0 %2814, %v2287_v52  }
  0x4a   :  { %739 = vperm.xlu1 %2815, %v2290_v53  }
  0x4b   :  { %734 = vperm.xlu0 %2814, %v2289_v54   ;;  %v2480_v54 = vld [vmem:[%s3457_s2 + $0x318] sm:$0xff] }
  0x4e   :  { %749 = vperm.xlu1 %2815, %v2292_v55   ;;  %v2479_v55 = vld [vmem:[%s3457_s2 + $0x310] sm:$0xff] }
  0x4f   :  { %744 = vperm.xlu0 %2814, %v2291_v56   ;;  %v2482_v56 = vld [vmem:[%s3457_s2 + $0x328] sm:$0xff] }
  0x52   :  { %886 = vperm.xlu1 %2815, %v2310_v57  }
  0x53   :  { %881 = vperm.xlu0 %2814, %v2309_v58   ;;  %v2481_v58 = vld [vmem:[%s3457_s2 + $0x320] sm:$0xff] }
  0x56   :  { %896 = vperm.xlu1 %2815, %v2312_v59  }
  0x57   :  { %891 = vperm.xlu0 %2814, %v2311_v60   ;;  %v2484_v60 = vld [vmem:[%s3457_s2 + $0x338] sm:$0xff] }
  0x5a   :  { %906 = vperm.xlu1 %2815, %v2314_v61   ;;  %v2483_v61 = vld [vmem:[%s3457_s2 + $0x330] sm:$0xff] }
  0x5b   :  { %901 = vperm.xlu0 %2814, %v2313_v62  }
  0x5e   :  { %916 = vperm.xlu1 %2815, %v2316_v63  }
  0x5f   :  { %911 = vperm.xlu0 %2814, %v2315_v0  }
  0x62   :  { %1053 = vperm.xlu1 %2815, %v2334_v1  }
  0x63   :  { %1048 = vperm.xlu0 %2814, %v2333_v2  }
  0x66   :  { %1063 = vperm.xlu1 %2815, %v2336_v3  }
  0x67   :  { %1058 = vperm.xlu0 %2814, %v2335_v4  }
  0x6a   :  { %1073 = vperm.xlu1 %2815, %v2338_v5  }
  0x6b   :  { %1068 = vperm.xlu0 %2814, %v2337_v6  }
  0x6e   :  { %1083 = vperm.xlu1 %2815, %v2340_v7  }
  0x6f   :  { %1078 = vperm.xlu0 %2814, %v2339_v8  }
  0x72   :  { %1220 = vperm.xlu1 %2815, %v2358_v9  }
  0x73   :  { %1215 = vperm.xlu0 %2814, %v2357_v10  }
  0x76   :  { %1230 = vperm.xlu1 %2815, %v2360_v11  }
  0x77   :  { %1225 = vperm.xlu0 %2814, %v2359_v12  }
  0x7a   :  { %1240 = vperm.xlu1 %2815, %v2362_v13  }
  0x7b   :  { %1235 = vperm.xlu0 %2814, %v2361_v14  }
  0x7e   :  { %1250 = vperm.xlu1 %2815, %v2364_v15  }
  0x7f   :  { %1245 = vperm.xlu0 %2814, %v2363_v16  }
  0x81   :  { %v56_v52 = vpop.permute.xlu1 %55  ;;  %v46_v53 = vpop.permute.xlu0 %45 }
  0x82   :  { %1387 = vperm.xlu1 %2815, %v2382_v17  }
  0x83   :  { %1382 = vperm.xlu0 %2814, %v2381_v19  }
  0x85   :  { %v61_v57 = vpop.permute.xlu1 %60 }
  0x86   :  { %1397 = vperm.xlu1 %2815, %v2384_v20   ;;  %v51_v59 = vpop.permute.xlu0 %50 }
  0x87   :  { %1392 = vperm.xlu0 %2814, %v2383_v21  }
  0x89   :  { %v71_v62 = vpop.permute.xlu1 %70 }
  0x8a   :  { %1407 = vperm.xlu1 %2815, %v2386_v22   ;;  %v66_v63 = vpop.permute.xlu0 %65 }
  0x8b   :  { %1402 = vperm.xlu0 %2814, %v2385_v23  }
  0x8d   :  { %v81_v18 = vpop.permute.xlu1 %80 }
  0x8e   :  { %1417 = vperm.xlu1 %2815, %v2388_v24   ;;  %v76_v13 = vpop.permute.xlu0 %75 }
  0x8f   :  { %1412 = vperm.xlu0 %2814, %v2387_v25  }
  0x92   :  { %1554 = vperm.xlu1 %2815, %v2406_v26  }
  0x93   :  { %1549 = vperm.xlu0 %2814, %v2405_v27  }
  0x96   :  { %1564 = vperm.xlu1 %2815, %v2408_v28  }
  0x97   :  { %1559 = vperm.xlu0 %2814, %v2407_v29  }
  0x9a   :  { %1574 = vperm.xlu1 %2815, %v2410_v30   ;;  %v2821_v30 = vld [vmem:[%s3459_s1 + $0x28] sm:$0xff]  }
  0x9b   :  { %1569 = vperm.xlu0 %2814, %v2409_v31   ;;  %v2822_v31 = vld [vmem:[%s3459_s1 + $0x30] sm:$0xff]  }
  0x9e   :  { %1584 = vperm.xlu1 %2815, %v2412_v32   ;;  %v2823_v32 = vld [vmem:[%s3459_s1 + $0x38] sm:$0xff]  }
  0x9f   :  { %1579 = vperm.xlu0 %2814, %v2411_v33   ;;  %v2824_v33 = vld [vmem:[%s3459_s1 + $0x40] sm:$0xff]  }
  0xa0   :  { %2637 = vmatprep.mubr.msk.bf16.mxu0 %vm103_vm0, %v2824_v33 }
  0xa2   :  { %1721 = vperm.xlu1 %2815, %v2430_v34   ;;  %v214_v34 = vpop.permute.xlu0 %213 }
  0xa3   :  { %1716 = vperm.xlu0 %2814, %v2429_v35   ;;  %v219_v35 = vpop.permute.xlu1 %218 }
  0xa6   :  { %1731 = vperm.xlu1 %2815, %v2432_v36   ;;  %v224_v36 = vpop.permute.xlu0 %223 }
  0xa7   :  { %1726 = vperm.xlu0 %2814, %v2431_v37   ;;  %v229_v37 = vpop.permute.xlu1 %228 }
  0xaa   :  { %1741 = vperm.xlu1 %2815, %v2434_v38  }
  0xab   :  { %1736 = vperm.xlu0 %2814, %v2433_v39  }
  0xae   :  { %1751 = vperm.xlu1 %2815, %v2436_v40  }
  0xaf   :  { %1746 = vperm.xlu0 %2814, %v2435_v41   ;;  %v234_v41 = vpop.permute.xlu0 %233 }
  0xb2   :  { %1888 = vperm.xlu1 %2815, %v2454_v42  }
  0xb3   :  { %1883 = vperm.xlu0 %2814, %v2453_v43  }
  0xb6   :  { %1898 = vperm.xlu1 %2815, %v2456_v44  }
  0xb7   :  { %1893 = vperm.xlu0 %2814, %v2455_v45  }
  0xba   :  { %1908 = vperm.xlu1 %2815, %v2458_v46   ;;  %v239_v46 = vpop.permute.xlu1 %238 }
  0xbb   :  { %1903 = vperm.xlu0 %2814, %v2457_v47  }
  0xbe   :  { %1918 = vperm.xlu1 %2815, %v2460_v48  }
  0xbf   :  { %1913 = vperm.xlu0 %2814, %v2459_v49  }
  0xc2   :  { %2055 = vperm.xlu1 %2815, %v2478_v50  }
  0xc3   :  { %2050 = vperm.xlu0 %2814, %v2477_v51  }
  0xc6   :  { %2065 = vperm.xlu1 %2815, %v2480_v54  }
  0xc7   :  { %2060 = vperm.xlu0 %2814, %v2479_v55  }
  0xca   :  { %2075 = vperm.xlu1 %2815, %v2482_v56  }
  0xcb   :  { %2070 = vperm.xlu0 %2814, %v2481_v58   ;;  %v249_v58 = vpop.permute.xlu1 %248 }
  0xce   :  { %2085 = vperm.xlu1 %2815, %v2484_v60  }
  0xcf   :  { %2080 = vperm.xlu0 %2814, %v2483_v61  }
  0xe8   :  { %v2607_v0 = vpop.f32.mrb[0].mxu0 }
  0xe9   :  { %v159_v1 = vadd.f32 %v2607_v0, %v56_v52  ;;  %v150_v2 = vpop.f32.mrb[1].mxu0 }
  0xea   :  { %v151_v3 = vadd.f32 %v150_v2, %v46_v53  ;;  %v2608_v4 = vpop.f32.mrb[2].mxu0  ;;  %v244_v53 = vpop.permute.xlu0 %243 }
  0xeb   :  { %v162_v5 = vadd.f32 %v2608_v4, %v61_v57  ;;  %v153_v6 = vpop.f32.mrb[3].mxu0  ;;  %v183_v8 = vmax.f32 %v159_v1, 0.0 }
  0xec   :  { %v154_v7 = vadd.f32 %v153_v6, %v51_v59  ;;  %v181_v10 = vmax.f32 %v151_v3, 0.0  ;;  %v2825_v6 = vld [vmem:[%s3459_s1 + $0x48] sm:$0xff]  }
  0xed   :  { %v184_v9 = vmax.f32 %v162_v5, 0.0 }
  0xee   :  { %v182_v11 = vmax.f32 %v154_v7, 0.0  ;;  %v2826_v7 = vld [vmem:[%s3459_s1 + $0x50] sm:$0xff]  }
  0xef   :  { %v190_v12 = vpack.c.bf16 %v184_v9, %v183_v8  ;;  %v2827_v8 = vld [vmem:[%s3459_s1 + $0x58] sm:$0xff]   ;;  %v2828_v9 = vld [vmem:[%s3459_s1 + $0x60] sm:$0xff]  }
  0xf0   :  { %v2611_v14 = vpop.f32.mrb[4].mxu0  ;;  %v189_v15 = vpack.c.bf16 %v182_v11, %v181_v10  ;;  %v381_v10 = vpop.permute.xlu0 %380 }
  0xf1   :  { %v175_v16 = vadd.f32 %v2611_v14, %v76_v13  ;;  %v166_v17 = vpop.f32.mrb[5].mxu0  ;;  %v386_v11 = vpop.permute.xlu1 %385 }
  0xf2   :  { %v167_v19 = vadd.f32 %v166_v17, %v66_v63  ;;  %v2612_v20 = vpop.f32.mrb[6].mxu0  ;;  %2613 = vmatprep.subr.bf16.mxu1 %v189_v15 }
  0xf3   :  { %v178_v21 = vadd.f32 %v2612_v20, %v81_v18  ;;  %v169_v22 = vpop.f32.mrb[7].mxu0  ;;  %2614 = vmatpush3.bf16.msra.mxu1 %v189_v15  ;;  %v187_v24 = vmax.f32 %v175_v16, 0.0 }
  0xf4   :  { %v170_v23 = vadd.f32 %v169_v22, %v71_v62  ;;  %2615 = vmatprep.subr.bf16.mxu1 %v190_v12  ;;  %v185_v26 = vmax.f32 %v167_v19, 0.0 }
  0xf5   :  { %v188_v25 = vmax.f32 %v178_v21, 0.0  ;;  %v396_v13 = vpop.permute.xlu1 %395 }
  0xf6   :  { %v186_v27 = vmax.f32 %v170_v23, 0.0 }
  0xf7   :  { %v192_v28 = vpack.c.bf16 %v188_v25, %v187_v24  ;;  %2616 = vmatpush3.bf16.msra.mxu1 %v190_v12  ;;  %v391_v12 = vpop.permute.xlu0 %390 }
  0xf8   :  { %v191_v29 = vpack.c.bf16 %v186_v27, %v185_v26 }
  0xf9   :  { %v406_v22 = vpop.permute.xlu1 %405 }
  0xfa   :  { %2617 = vmatprep.subr.bf16.mxu1 %v191_v29 }
  0xfb   :  { %2618 = vmatpush3.bf16.msra.mxu1 %v191_v29  ;;  %v401_v17 = vpop.permute.xlu0 %400 }
  0xfc   :  { %2619 = vmatprep.subr.bf16.mxu1 %v192_v28 }
  0xff   :  { %2620 = vmatpush3.bf16.msra.mxu1 %v192_v28  ;;  %v411_v29 = vpop.permute.xlu0 %410 }
 0x102   :  { %2622 = vmatmul.mubr.msk.bf16.vlgmr.msra.gmra.mrb[0].mxu1 %vm103_vm0, %v2821_v30 }
 0x103   :  { %2625 = vmatprep.mubr.msk.bf16.mxu1 %vm103_vm0, %v2822_v31 }
 0x10a   :  { %2626 = vmatmul.mubr.msk.bf16.gmra.mrb[4].mxu1 %vm103_vm0, %v2823_v32 }
 0x10b   :  { %2653 = vmatprep.mubr.msk.bf16.mxu1 %vm103_vm0, %v2828_v9 }
 0x1d5   :  { %v2623_v38 = vpop.f32.mrb[0].mxu1 }
 0x1d6   :  { %v326_v39 = vadd.f32 %v2623_v38, %v224_v36  ;;  %v317_v40 = vpop.f32.mrb[1].mxu1 }
 0x1d7   :  { %v318_v42 = vadd.f32 %v317_v40, %v214_v34  ;;  %v2624_v43 = vpop.f32.mrb[2].mxu1  ;;  %v416_v34 = vpop.permute.xlu1 %415 }
 0x1d8   :  { %v329_v44 = vadd.f32 %v2624_v43, %v229_v37  ;;  %v320_v45 = vpop.f32.mrb[3].mxu1  ;;  %v350_v48 = vmax.f32 %v326_v39, 0.0 }
 0x1d9   :  { %v321_v47 = vadd.f32 %v320_v45, %v219_v35  ;;  %v348_v50 = vmax.f32 %v318_v42, 0.0 }
 0x1da   :  { %v351_v49 = vmax.f32 %v329_v44, 0.0 }
 0x1db   :  { %v349_v51 = vmax.f32 %v321_v47, 0.0  ;;  %v2830_v47 = vld [vmem:[%s3459_s1 + $0x70] sm:$0xff]  }
 0x1dc   :  { %v357_v52 = vpack.c.bf16 %v351_v49, %v350_v48  ;;  %v2831_v48 = vld [vmem:[%s3459_s1 + $0x78] sm:$0xff]   ;;  %v2832_v49 = vld [vmem:[%s3459_s1 + $0x80] sm:$0xff]  }
 0x1dd   :  { %v356_v54 = vpack.c.bf16 %v349_v51, %v348_v50  ;;  %v2627_v55 = vpop.f32.mrb[4].mxu1  ;;  %v548_v50 = vpop.permute.xlu0 %547 }
 0x1de   :  { %v342_v56 = vadd.f32 %v2627_v55, %v244_v53  ;;  %v333_v57 = vpop.f32.mrb[5].mxu1  ;;  %v553_v51 = vpop.permute.xlu1 %552 }
 0x1df   :  { %v334_v59 = vadd.f32 %v333_v57, %v234_v41  ;;  %v2628_v60 = vpop.f32.mrb[6].mxu1  ;;  %2629 = vmatprep.subr.bf16.mxu0 %v356_v54 }
 0x1e0   :  { %v345_v61 = vadd.f32 %v2628_v60, %v249_v58  ;;  %v336_v62 = vpop.f32.mrb[7].mxu1  ;;  %2630 = vmatpush3.bf16.msra.mxu0 %v356_v54  ;;  %v354_v0 = vmax.f32 %v342_v56, 0.0 }
 0x1e1   :  { %v337_v63 = vadd.f32 %v336_v62, %v239_v46  ;;  %2631 = vmatprep.subr.bf16.mxu0 %v357_v52  ;;  %v352_v2 = vmax.f32 %v334_v59, 0.0  ;;  %v2829_v46 = vld [vmem:[%s3459_s1 + $0x68] sm:$0xff]  }
 0x1e2   :  { %v355_v1 = vmax.f32 %v345_v61, 0.0  ;;  %v563_v53 = vpop.permute.xlu1 %562 }
 0x1e3   :  { %v353_v3 = vmax.f32 %v337_v63, 0.0 }
 0x1e4   :  { %v359_v4 = vpack.c.bf16 %v355_v1, %v354_v0  ;;  %2632 = vmatpush3.bf16.msra.mxu0 %v357_v52  ;;  %v558_v52 = vpop.permute.xlu0 %557 }
 0x1e5   :  { %v358_v5 = vpack.c.bf16 %v353_v3, %v352_v2 }
 0x1e6   :  { %v573_v62 = vpop.permute.xlu1 %572 }
 0x1e7   :  { %2633 = vmatprep.subr.bf16.mxu0 %v358_v5 }
 0x1e8   :  { %2634 = vmatpush3.bf16.msra.mxu0 %v358_v5  ;;  %v568_v57 = vpop.permute.xlu0 %567 }
 0x1e9   :  { %2635 = vmatprep.subr.bf16.mxu0 %v359_v4 }
 0x1ec   :  { %2636 = vmatpush3.bf16.msra.mxu0 %v359_v4  ;;  %v578_v5 = vpop.permute.xlu0 %577 }
 0x1ef   :  { %2638 = vmatmul.mubr.msk.bf16.vlgmr.msra.gmra.mrb[8].mxu0 %vm103_vm0, %v2825_v6 }
 0x1f0   :  { %2641 = vmatprep.mubr.msk.bf16.mxu0 %vm103_vm0, %v2826_v7 }
 0x1f7   :  { %2642 = vmatmul.mubr.msk.bf16.gmra.mrb[12].mxu0 %vm103_vm0, %v2827_v8 }
 0x1f8   :  { %2669 = vmatprep.mubr.msk.bf16.mxu0 %vm103_vm0, %v2832_v49 }
 0x2c2   :  { %v2639_v14 = vpop.f32.mrb[8].mxu0 }
 0x2c3   :  { %v493_v15 = vadd.f32 %v2639_v14, %v391_v12  ;;  %v484_v16 = vpop.f32.mrb[9].mxu0 }
 0x2c4   :  { %v485_v18 = vadd.f32 %v484_v16, %v381_v10  ;;  %v2640_v19 = vpop.f32.mrb[10].mxu0  ;;  %v583_v10 = vpop.permute.xlu1 %582 }
 0x2c5   :  { %v496_v20 = vadd.f32 %v2640_v19, %v396_v13  ;;  %v487_v21 = vpop.f32.mrb[11].mxu0  ;;  %v517_v24 = vmax.f32 %v493_v15, 0.0 }
 0x2c6   :  { %v488_v23 = vadd.f32 %v487_v21, %v386_v11  ;;  %v515_v26 = vmax.f32 %v485_v18, 0.0 }
 0x2c7   :  { %v518_v25 = vmax.f32 %v496_v20, 0.0 }
 0x2c8   :  { %v516_v27 = vmax.f32 %v488_v23, 0.0  ;;  %v2834_v23 = vld [vmem:[%s3459_s1 + $0x90] sm:$0xff]  }
 0x2c9   :  { %v524_v28 = vpack.c.bf16 %v518_v25, %v517_v24  ;;  %v2835_v24 = vld [vmem:[%s3459_s1 + $0x98] sm:$0xff]   ;;  %v2836_v25 = vld [vmem:[%s3459_s1 + $0xa0] sm:$0xff]  }
 0x2ca   :  { %v523_v30 = vpack.c.bf16 %v516_v27, %v515_v26  ;;  %v2643_v31 = vpop.f32.mrb[12].mxu0  ;;  %v715_v26 = vpop.permute.xlu0 %714 }
 0x2cb   :  { %v509_v32 = vadd.f32 %v2643_v31, %v411_v29  ;;  %v500_v33 = vpop.f32.mrb[13].mxu0  ;;  %v720_v27 = vpop.permute.xlu1 %719 }
 0x2cc   :  { %v501_v35 = vadd.f32 %v500_v33, %v401_v17  ;;  %v2644_v36 = vpop.f32.mrb[14].mxu0  ;;  %2645 = vmatprep.subr.bf16.mxu1 %v523_v30 }
 0x2cd   :  { %v512_v37 = vadd.f32 %v2644_v36, %v416_v34  ;;  %v503_v38 = vpop.f32.mrb[15].mxu0  ;;  %2646 = vmatpush3.bf16.msra.mxu1 %v523_v30  ;;  %v521_v40 = vmax.f32 %v509_v32, 0.0 }
 0x2ce   :  { %v504_v39 = vadd.f32 %v503_v38, %v406_v22  ;;  %2647 = vmatprep.subr.bf16.mxu1 %v524_v28  ;;  %v519_v42 = vmax.f32 %v501_v35, 0.0  ;;  %v2833_v22 = vld [vmem:[%s3459_s1 + $0x88] sm:$0xff]  }
 0x2cf   :  { %v522_v41 = vmax.f32 %v512_v37, 0.0  ;;  %v730_v29 = vpop.permute.xlu1 %729 }
 0x2d0   :  { %v520_v43 = vmax.f32 %v504_v39, 0.0 }
 0x2d1   :  { %v526_v44 = vpack.c.bf16 %v522_v41, %v521_v40  ;;  %2648 = vmatpush3.bf16.msra.mxu1 %v524_v28  ;;  %v725_v28 = vpop.permute.xlu0 %724 }
 0x2d2   :  { %v525_v45 = vpack.c.bf16 %v520_v43, %v519_v42 }
 0x2d3   :  { %v740_v38 = vpop.permute.xlu1 %739 }
 0x2d4   :  { %2649 = vmatprep.subr.bf16.mxu1 %v525_v45 }
 0x2d5   :  { %2650 = vmatpush3.bf16.msra.mxu1 %v525_v45  ;;  %v735_v33 = vpop.permute.xlu0 %734 }
 0x2d6   :  { %2651 = vmatprep.subr.bf16.mxu1 %v526_v44 }
 0x2d9   :  { %2652 = vmatpush3.bf16.msra.mxu1 %v526_v44  ;;  %v745_v45 = vpop.permute.xlu0 %744 }
 0x2dc   :  { %2654 = vmatmul.mubr.msk.bf16.vlgmr.msra.gmra.mrb[8].mxu1 %vm103_vm0, %v2829_v46 }
 0x2dd   :  { %2657 = vmatprep.mubr.msk.bf16.mxu1 %vm103_vm0, %v2830_v47 }
 0x2e4   :  { %2658 = vmatmul.mubr.msk.bf16.gmra.mrb[12].mxu1 %vm103_vm0, %v2831_v48 }
 0x2e5   :  { %2685 = vmatprep.mubr.msk.bf16.mxu1 %vm103_vm0, %v2836_v25 }
 0x3af   :  { %v2655_v54 = vpop.f32.mrb[8].mxu1 }
 0x3b0   :  { %v660_v55 = vadd.f32 %v2655_v54, %v558_v52  ;;  %v651_v56 = vpop.f32.mrb[9].mxu1 }
 0x3b1   :  { %v652_v58 = vadd.f32 %v651_v56, %v548_v50  ;;  %v2656_v59 = vpop.f32.mrb[10].mxu1  ;;  %v750_v50 = vpop.permute.xlu1 %749 }
 0x3b2   :  { %v663_v60 = vadd.f32 %v2656_v59, %v563_v53  ;;  %v654_v61 = vpop.f32.mrb[11].mxu1  ;;  %v684_v0 = vmax.f32 %v660_v55, 0.0 }
 0x3b3   :  { %v655_v63 = vadd.f32 %v654_v61, %v553_v51  ;;  %v682_v2 = vmax.f32 %v652_v58, 0.0 }
 0x3b4   :  { %v685_v1 = vmax.f32 %v663_v60, 0.0 }
 0x3b5   :  { %v683_v3 = vmax.f32 %v655_v63, 0.0  ;;  %v2838_v63 = vld [vmem:[%s3459_s1 + $0xb0] sm:$0xff]  }
 0x3b6   :  { %v691_v4 = vpack.c.bf16 %v685_v1, %v684_v0  ;;  %v2839_v0 = vld [vmem:[%s3459_s1 + $0xb8] sm:$0xff]   ;;  %v2840_v1 = vld [vmem:[%s3459_s1 + $0xc0] sm:$0xff]  }
 0x3b7   :  { %v690_v6 = vpack.c.bf16 %v683_v3, %v682_v2  ;;  %v2659_v7 = vpop.f32.mrb[12].mxu1  ;;  %v882_v2 = vpop.permute.xlu0 %881 }
 0x3b8   :  { %v676_v8 = vadd.f32 %v2659_v7, %v578_v5  ;;  %v667_v9 = vpop.f32.mrb[13].mxu1  ;;  %v887_v3 = vpop.permute.xlu1 %886 }
 0x3b9   :  { %v668_v11 = vadd.f32 %v667_v9, %v568_v57  ;;  %v2660_v12 = vpop.f32.mrb[14].mxu1  ;;  %2661 = vmatprep.subr.bf16.mxu0 %v690_v6 }
 0x3ba   :  { %v679_v13 = vadd.f32 %v2660_v12, %v583_v10  ;;  %v670_v14 = vpop.f32.mrb[15].mxu1  ;;  %2662 = vmatpush3.bf16.msra.mxu0 %v690_v6  ;;  %v688_v16 = vmax.f32 %v676_v8, 0.0 }
 0x3bb   :  { %v671_v15 = vadd.f32 %v670_v14, %v573_v62  ;;  %2663 = vmatprep.subr.bf16.mxu0 %v691_v4  ;;  %v686_v18 = vmax.f32 %v668_v11, 0.0  ;;  %v2837_v62 = vld [vmem:[%s3459_s1 + $0xa8] sm:$0xff]  }
 0x3bc   :  { %v689_v17 = vmax.f32 %v679_v13, 0.0  ;;  %v897_v5 = vpop.permute.xlu1 %896 }
 0x3bd   :  { %v687_v19 = vmax.f32 %v671_v15, 0.0 }
 0x3be   :  { %v693_v20 = vpack.c.bf16 %v689_v17, %v688_v16  ;;  %2664 = vmatpush3.bf16.msra.mxu0 %v691_v4  ;;  %v892_v4 = vpop.permute.xlu0 %891 }
 0x3bf   :  { %v692_v21 = vpack.c.bf16 %v687_v19, %v686_v18 }
 0x3c0   :  { %v907_v14 = vpop.permute.xlu1 %906 }
 0x3c1   :  { %2665 = vmatprep.subr.bf16.mxu0 %v692_v21 }
 0x3c2   :  { %2666 = vmatpush3.bf16.msra.mxu0 %v692_v21  ;;  %v902_v9 = vpop.permute.xlu0 %901 }
 0x3c3   :  { %2667 = vmatprep.subr.bf16.mxu0 %v693_v20 }
 0x3c6   :  { %2668 = vmatpush3.bf16.msra.mxu0 %v693_v20  ;;  %v912_v21 = vpop.permute.xlu0 %911 }
 0x3c9   :  { %2670 = vmatmul.mubr.msk.bf16.vlgmr.msra.gmra.mrb[16].mxu0 %vm103_vm0, %v2833_v22 }
 0x3ca   :  { %2673 = vmatprep.mubr.msk.bf16.mxu0 %vm103_vm0, %v2834_v23 }
 0x3d1   :  { %2674 = vmatmul.mubr.msk.bf16.gmra.mrb[20].mxu0 %vm103_vm0, %v2835_v24 }
 0x3d2   :  { %2701 = vmatprep.mubr.msk.bf16.mxu0 %vm103_vm0, %v2840_v1 }
 0x49c   :  { %v2671_v30 = vpop.f32.mrb[16].mxu0 }
 0x49d   :  { %v827_v31 = vadd.f32 %v2671_v30, %v725_v28  ;;  %v818_v32 = vpop.f32.mrb[17].mxu0 }
 0x49e   :  { %v819_v34 = vadd.f32 %v818_v32, %v715_v26  ;;  %v2672_v35 = vpop.f32.mrb[18].mxu0  ;;  %v917_v26 = vpop.permute.xlu1 %916 }
 0x49f   :  { %v830_v36 = vadd.f32 %v2672_v35, %v730_v29  ;;  %v821_v37 = vpop.f32.mrb[19].mxu0  ;;  %v851_v40 = vmax.f32 %v827_v31, 0.0 }
 0x4a0   :  { %v822_v39 = vadd.f32 %v821_v37, %v720_v27  ;;  %v849_v42 = vmax.f32 %v819_v34, 0.0 }
 0x4a1   :  { %v852_v41 = vmax.f32 %v830_v36, 0.0 }
 0x4a2   :  { %v850_v43 = vmax.f32 %v822_v39, 0.0  ;;  %v2842_v39 = vld [vmem:[%s3459_s1 + $0xd0] sm:$0xff]  }
 0x4a3   :  { %v858_v44 = vpack.c.bf16 %v852_v41, %v851_v40  ;;  %v2843_v40 = vld [vmem:[%s3459_s1 + $0xd8] sm:$0xff]   ;;  %v2844_v41 = vld [vmem:[%s3459_s1 + $0xe0] sm:$0xff]  }
 0x4a4   :  { %v857_v46 = vpack.c.bf16 %v850_v43, %v849_v42  ;;  %v2675_v47 = vpop.f32.mrb[20].mxu0  ;;  %v1049_v42 = vpop.permute.xlu0 %1048 }
 0x4a5   :  { %v843_v48 = vadd.f32 %v2675_v47, %v745_v45  ;;  %v834_v49 = vpop.f32.mrb[21].mxu0  ;;  %v1054_v43 = vpop.permute.xlu1 %1053 }
 0x4a6   :  { %v835_v51 = vadd.f32 %v834_v49, %v735_v33  ;;  %v2676_v52 = vpop.f32.mrb[22].mxu0  ;;  %2677 = vmatprep.subr.bf16.mxu1 %v857_v46 }
 0x4a7   :  { %v846_v53 = vadd.f32 %v2676_v52, %v750_v50  ;;  %v837_v54 = vpop.f32.mrb[23].mxu0  ;;  %2678 = vmatpush3.bf16.msra.mxu1 %v857_v46  ;;  %v855_v56 = vmax.f32 %v843_v48, 0.0 }
 0x4a8   :  { %v838_v55 = vadd.f32 %v837_v54, %v740_v38  ;;  %2679 = vmatprep.subr.bf16.mxu1 %v858_v44  ;;  %v853_v58 = vmax.f32 %v835_v51, 0.0  ;;  %v2841_v38 = vld [vmem:[%s3459_s1 + $0xc8] sm:$0xff]  }
 0x4a9   :  { %v856_v57 = vmax.f32 %v846_v53, 0.0  ;;  %v1064_v45 = vpop.permute.xlu1 %1063 }
 0x4aa   :  { %v854_v59 = vmax.f32 %v838_v55, 0.0 }
 0x4ab   :  { %v860_v60 = vpack.c.bf16 %v856_v57, %v855_v56  ;;  %2680 = vmatpush3.bf16.msra.mxu1 %v858_v44  ;;  %v1059_v44 = vpop.permute.xlu0 %1058 }
 0x4ac   :  { %v859_v61 = vpack.c.bf16 %v854_v59, %v853_v58 }
 0x4ad   :  { %v1074_v54 = vpop.permute.xlu1 %1073 }
 0x4ae   :  { %2681 = vmatprep.subr.bf16.mxu1 %v859_v61 }
 0x4af   :  { %2682 = vmatpush3.bf16.msra.mxu1 %v859_v61  ;;  %v1069_v49 = vpop.permute.xlu0 %1068 }
 0x4b0   :  { %2683 = vmatprep.subr.bf16.mxu1 %v860_v60 }
 0x4b3   :  { %2684 = vmatpush3.bf16.msra.mxu1 %v860_v60  ;;  %v1079_v61 = vpop.permute.xlu0 %1078 }
 0x4b6   :  { %2686 = vmatmul.mubr.msk.bf16.vlgmr.msra.gmra.mrb[16].mxu1 %vm103_vm0, %v2837_v62 }
 0x4b7   :  { %2689 = vmatprep.mubr.msk.bf16.mxu1 %vm103_vm0, %v2838_v63 }
 0x4be   :  { %2690 = vmatmul.mubr.msk.bf16.gmra.mrb[20].mxu1 %vm103_vm0, %v2839_v0 }
 0x4bf   :  { %2717 = vmatprep.mubr.msk.bf16.mxu1 %vm103_vm0, %v2844_v41 }
 0x589   :  { %v2687_v6 = vpop.f32.mrb[16].mxu1 }
 0x58a   :  { %v994_v7 = vadd.f32 %v2687_v6, %v892_v4  ;;  %v985_v8 = vpop.f32.mrb[17].mxu1 }
 0x58b   :  { %v986_v10 = vadd.f32 %v985_v8, %v882_v2  ;;  %v2688_v11 = vpop.f32.mrb[18].mxu1  ;;  %v1084_v2 = vpop.permute.xlu1 %1083 }
 0x58c   :  { %v997_v12 = vadd.f32 %v2688_v11, %v897_v5  ;;  %v988_v13 = vpop.f32.mrb[19].mxu1  ;;  %v1018_v16 = vmax.f32 %v994_v7, 0.0 }
 0x58d   :  { %v989_v15 = vadd.f32 %v988_v13, %v887_v3  ;;  %v1016_v18 = vmax.f32 %v986_v10, 0.0 }
 0x58e   :  { %v1019_v17 = vmax.f32 %v997_v12, 0.0 }
 0x58f   :  { %v1017_v19 = vmax.f32 %v989_v15, 0.0  ;;  %v2846_v15 = vld [vmem:[%s3459_s1 + $0xf0] sm:$0xff]  }
 0x590   :  { %v1025_v20 = vpack.c.bf16 %v1019_v17, %v1018_v16  ;;  %v2847_v16 = vld [vmem:[%s3459_s1 + $0xf8] sm:$0xff]   ;;  %v2848_v17 = vld [vmem:[%s3459_s1 + $0x100] sm:$0xff]  }
 0x591   :  { %v1024_v22 = vpack.c.bf16 %v1017_v19, %v1016_v18  ;;  %v2691_v23 = vpop.f32.mrb[20].mxu1  ;;  %v1216_v18 = vpop.permute.xlu0 %1215 }
 0x592   :  { %v1010_v24 = vadd.f32 %v2691_v23, %v912_v21  ;;  %v1001_v25 = vpop.f32.mrb[21].mxu1  ;;  %v1221_v19 = vpop.permute.xlu1 %1220 }
 0x593   :  { %v1002_v27 = vadd.f32 %v1001_v25, %v902_v9  ;;  %v2692_v28 = vpop.f32.mrb[22].mxu1  ;;  %2693 = vmatprep.subr.bf16.mxu0 %v1024_v22 }
 0x594   :  { %v1013_v29 = vadd.f32 %v2692_v28, %v917_v26  ;;  %v1004_v30 = vpop.f32.mrb[23].mxu1  ;;  %2694 = vmatpush3.bf16.msra.mxu0 %v1024_v22  ;;  %v1022_v32 = vmax.f32 %v1010_v24, 0.0 }
 0x595   :  { %v1005_v31 = vadd.f32 %v1004_v30, %v907_v14  ;;  %2695 = vmatprep.subr.bf16.mxu0 %v1025_v20  ;;  %v1020_v34 = vmax.f32 %v1002_v27, 0.0  ;;  %v2845_v14 = vld [vmem:[%s3459_s1 + $0xe8] sm:$0xff]  }
 0x596   :  { %v1023_v33 = vmax.f32 %v1013_v29, 0.0  ;;  %v1231_v21 = vpop.permute.xlu1 %1230 }
 0x597   :  { %v1021_v35 = vmax.f32 %v1005_v31, 0.0 }
 0x598   :  { %v1027_v36 = vpack.c.bf16 %v1023_v33, %v1022_v32  ;;  %2696 = vmatpush3.bf16.msra.mxu0 %v1025_v20  ;;  %v1226_v20 = vpop.permute.xlu0 %1225 }
 0x599   :  { %v1026_v37 = vpack.c.bf16 %v1021_v35, %v1020_v34 }
 0x59a   :  { %v1241_v30 = vpop.permute.xlu1 %1240 }
 0x59b   :  { %2697 = vmatprep.subr.bf16.mxu0 %v1026_v37 }
 0x59c   :  { %2698 = vmatpush3.bf16.msra.mxu0 %v1026_v37  ;;  %v1236_v25 = vpop.permute.xlu0 %1235 }
 0x59d   :  { %2699 = vmatprep.subr.bf16.mxu0 %v1027_v36 }
 0x5a0   :  { %2700 = vmatpush3.bf16.msra.mxu0 %v1027_v36  ;;  %v1246_v37 = vpop.permute.xlu0 %1245 }
 0x5a3   :  { %2702 = vmatmul.mubr.msk.bf16.vlgmr.msra.gmra.mrb[24].mxu0 %vm103_vm0, %v2841_v38 }
 0x5a4   :  { %2705 = vmatprep.mubr.msk.bf16.mxu0 %vm103_vm0, %v2842_v39 }
 0x5ab   :  { %2706 = vmatmul.mubr.msk.bf16.gmra.mrb[28].mxu0 %vm103_vm0, %v2843_v40 }
 0x5ac   :  { %2733 = vmatprep.mubr.msk.bf16.mxu0 %vm103_vm0, %v2848_v17 }
 0x676   :  { %v2703_v46 = vpop.f32.mrb[24].mxu0 }
 0x677   :  { %v1161_v47 = vadd.f32 %v2703_v46, %v1059_v44  ;;  %v1152_v48 = vpop.f32.mrb[25].mxu0 }
 0x678   :  { %v1153_v50 = vadd.f32 %v1152_v48, %v1049_v42  ;;  %v2704_v51 = vpop.f32.mrb[26].mxu0  ;;  %v1251_v42 = vpop.permute.xlu1 %1250 }
 0x679   :  { %v1164_v52 = vadd.f32 %v2704_v51, %v1064_v45  ;;  %v1155_v53 = vpop.f32.mrb[27].mxu0  ;;  %v1185_v56 = vmax.f32 %v1161_v47, 0.0 }
 0x67a   :  { %v1156_v55 = vadd.f32 %v1155_v53, %v1054_v43  ;;  %v1183_v58 = vmax.f32 %v1153_v50, 0.0 }
 0x67b   :  { %v1186_v57 = vmax.f32 %v1164_v52, 0.0 }
 0x67c   :  { %v1184_v59 = vmax.f32 %v1156_v55, 0.0  ;;  %v2850_v55 = vld [vmem:[%s3459_s1 + $0x110] sm:$0xff]  }
 0x67d   :  { %v1192_v60 = vpack.c.bf16 %v1186_v57, %v1185_v56  ;;  %v2851_v56 = vld [vmem:[%s3459_s1 + $0x118] sm:$0xff]   ;;  %v2852_v57 = vld [vmem:[%s3459_s1 + $0x120] sm:$0xff]  }
 0x67e   :  { %v1191_v62 = vpack.c.bf16 %v1184_v59, %v1183_v58  ;;  %v2707_v63 = vpop.f32.mrb[28].mxu0  ;;  %v1383_v58 = vpop.permute.xlu0 %1382 }
 0x67f   :  { %v1177_v0 = vadd.f32 %v2707_v63, %v1079_v61  ;;  %v1168_v1 = vpop.f32.mrb[29].mxu0  ;;  %v1388_v59 = vpop.permute.xlu1 %1387 }
 0x680   :  { %v1169_v3 = vadd.f32 %v1168_v1, %v1069_v49  ;;  %v2708_v4 = vpop.f32.mrb[30].mxu0  ;;  %2709 = vmatprep.subr.bf16.mxu1 %v1191_v62 }
 0x681   :  { %v1180_v5 = vadd.f32 %v2708_v4, %v1084_v2  ;;  %v1171_v6 = vpop.f32.mrb[31].mxu0  ;;  %2710 = vmatpush3.bf16.msra.mxu1 %v1191_v62  ;;  %v1189_v8 = vmax.f32 %v1177_v0, 0.0 }
 0x682   :  { %v1172_v7 = vadd.f32 %v1171_v6, %v1074_v54  ;;  %2711 = vmatprep.subr.bf16.mxu1 %v1192_v60  ;;  %v1187_v10 = vmax.f32 %v1169_v3, 0.0  ;;  %v2849_v54 = vld [vmem:[%s3459_s1 + $0x108] sm:$0xff]  }
 0x683   :  { %v1190_v9 = vmax.f32 %v1180_v5, 0.0  ;;  %v1398_v61 = vpop.permute.xlu1 %1397 }
 0x684   :  { %v1188_v11 = vmax.f32 %v1172_v7, 0.0 }
 0x685   :  { %v1194_v12 = vpack.c.bf16 %v1190_v9, %v1189_v8  ;;  %2712 = vmatpush3.bf16.msra.mxu1 %v1192_v60  ;;  %v1393_v60 = vpop.permute.xlu0 %1392 }
 0x686   :  { %v1193_v13 = vpack.c.bf16 %v1188_v11, %v1187_v10 }
 0x687   :  { %v1408_v6 = vpop.permute.xlu1 %1407 }
 0x688   :  { %2713 = vmatprep.subr.bf16.mxu1 %v1193_v13 }
 0x689   :  { %2714 = vmatpush3.bf16.msra.mxu1 %v1193_v13  ;;  %v1403_v1 = vpop.permute.xlu0 %1402 }
 0x68a   :  { %2715 = vmatprep.subr.bf16.mxu1 %v1194_v12 }
 0x68d   :  { %2716 = vmatpush3.bf16.msra.mxu1 %v1194_v12  ;;  %v1413_v13 = vpop.permute.xlu0 %1412 }
 0x690   :  { %2718 = vmatmul.mubr.msk.bf16.vlgmr.msra.gmra.mrb[24].mxu1 %vm103_vm0, %v2845_v14 }
 0x691   :  { %2721 = vmatprep.mubr.msk.bf16.mxu1 %vm103_vm0, %v2846_v15 }
 0x698   :  { %2722 = vmatmul.mubr.msk.bf16.gmra.mrb[28].mxu1 %vm103_vm0, %v2847_v16 }
 0x699   :  { %2749 = vmatprep.mubr.msk.bf16.mxu1 %vm103_vm0, %v2852_v57 }
 0x763   :  { %v2719_v22 = vpop.f32.mrb[24].mxu1 }
 0x764   :  { %v1328_v23 = vadd.f32 %v2719_v22, %v1226_v20  ;;  %v1319_v24 = vpop.f32.mrb[25].mxu1 }
 0x765   :  { %v1320_v26 = vadd.f32 %v1319_v24, %v1216_v18  ;;  %v2720_v27 = vpop.f32.mrb[26].mxu1  ;;  %v1418_v18 = vpop.permute.xlu1 %1417 }
 0x766   :  { %v1331_v28 = vadd.f32 %v2720_v27, %v1231_v21  ;;  %v1322_v29 = vpop.f32.mrb[27].mxu1  ;;  %v1352_v32 = vmax.f32 %v1328_v23, 0.0 }
 0x767   :  { %v1323_v31 = vadd.f32 %v1322_v29, %v1221_v19  ;;  %v1350_v34 = vmax.f32 %v1320_v26, 0.0 }
 0x768   :  { %v1353_v33 = vmax.f32 %v1331_v28, 0.0 }
 0x769   :  { %v1351_v35 = vmax.f32 %v1323_v31, 0.0  ;;  %v2854_v31 = vld [vmem:[%s3459_s1 + $0x130] sm:$0xff]  }
 0x76a   :  { %v1359_v36 = vpack.c.bf16 %v1353_v33, %v1352_v32  ;;  %v2855_v32 = vld [vmem:[%s3459_s1 + $0x138] sm:$0xff]   ;;  %v2856_v33 = vld [vmem:[%s3459_s1 + $0x140] sm:$0xff]  }
 0x76b   :  { %v1358_v38 = vpack.c.bf16 %v1351_v35, %v1350_v34  ;;  %v2723_v39 = vpop.f32.mrb[28].mxu1  ;;  %v1550_v34 = vpop.permute.xlu0 %1549 }
 0x76c   :  { %v1344_v40 = vadd.f32 %v2723_v39, %v1246_v37  ;;  %v1335_v41 = vpop.f32.mrb[29].mxu1  ;;  %v1555_v35 = vpop.permute.xlu1 %1554 }
 0x76d   :  { %v1336_v43 = vadd.f32 %v1335_v41, %v1236_v25  ;;  %v2724_v44 = vpop.f32.mrb[30].mxu1  ;;  %2725 = vmatprep.subr.bf16.mxu0 %v1358_v38 }
 0x76e   :  { %v1347_v45 = vadd.f32 %v2724_v44, %v1251_v42  ;;  %v1338_v46 = vpop.f32.mrb[31].mxu1  ;;  %2726 = vmatpush3.bf16.msra.mxu0 %v1358_v38  ;;  %v1356_v48 = vmax.f32 %v1344_v40, 0.0 }
 0x76f   :  { %v1339_v47 = vadd.f32 %v1338_v46, %v1241_v30  ;;  %2727 = vmatprep.subr.bf16.mxu0 %v1359_v36  ;;  %v1354_v50 = vmax.f32 %v1336_v43, 0.0  ;;  %v2853_v30 = vld [vmem:[%s3459_s1 + $0x128] sm:$0xff]  }
 0x770   :  { %v1357_v49 = vmax.f32 %v1347_v45, 0.0  ;;  %v1565_v37 = vpop.permute.xlu1 %1564 }
 0x771   :  { %v1355_v51 = vmax.f32 %v1339_v47, 0.0 }
 0x772   :  { %v1361_v52 = vpack.c.bf16 %v1357_v49, %v1356_v48  ;;  %2728 = vmatpush3.bf16.msra.mxu0 %v1359_v36  ;;  %v1560_v36 = vpop.permute.xlu0 %1559 }
 0x773   :  { %v1360_v53 = vpack.c.bf16 %v1355_v51, %v1354_v50 }
 0x774   :  { %v1575_v46 = vpop.permute.xlu1 %1574 }
 0x775   :  { %2729 = vmatprep.subr.bf16.mxu0 %v1360_v53 }
 0x776   :  { %2730 = vmatpush3.bf16.msra.mxu0 %v1360_v53  ;;  %v1570_v41 = vpop.permute.xlu0 %1569 }
 0x777   :  { %2731 = vmatprep.subr.bf16.mxu0 %v1361_v52 }
 0x77a   :  { %2732 = vmatpush3.bf16.msra.mxu0 %v1361_v52  ;;  %v1580_v53 = vpop.permute.xlu0 %1579 }
 0x77d   :  { %2734 = vmatmul.mubr.msk.bf16.vlgmr.msra.gmra.mrb[32].mxu0 %vm103_vm0, %v2849_v54 }
 0x77e   :  { %2737 = vmatprep.mubr.msk.bf16.mxu0 %vm103_vm0, %v2850_v55 }
 0x785   :  { %2738 = vmatmul.mubr.msk.bf16.gmra.mrb[36].mxu0 %vm103_vm0, %v2851_v56 }
 0x786   :  { %2765 = vmatprep.mubr.msk.bf16.mxu0 %vm103_vm0, %v2856_v33 }
 0x850   :  { %v2735_v62 = vpop.f32.mrb[32].mxu0 }
 0x851   :  { %v1495_v63 = vadd.f32 %v2735_v62, %v1393_v60  ;;  %v1486_v0 = vpop.f32.mrb[33].mxu0 }
 0x852   :  { %v1487_v2 = vadd.f32 %v1486_v0, %v1383_v58  ;;  %v2736_v3 = vpop.f32.mrb[34].mxu0  ;;  %v1585_v58 = vpop.permute.xlu1 %1584 }
 0x853   :  { %v1498_v4 = vadd.f32 %v2736_v3, %v1398_v61  ;;  %v1489_v5 = vpop.f32.mrb[35].mxu0  ;;  %v1519_v8 = vmax.f32 %v1495_v63, 0.0 }
 0x854   :  { %v1490_v7 = vadd.f32 %v1489_v5, %v1388_v59  ;;  %v1517_v10 = vmax.f32 %v1487_v2, 0.0 }
 0x855   :  { %v1520_v9 = vmax.f32 %v1498_v4, 0.0 }
 0x856   :  { %v1518_v11 = vmax.f32 %v1490_v7, 0.0  ;;  %v2858_v7 = vld [vmem:[%s3459_s1 + $0x150] sm:$0xff]  }
 0x857   :  { %v1526_v12 = vpack.c.bf16 %v1520_v9, %v1519_v8  ;;  %v2859_v8 = vld [vmem:[%s3459_s1 + $0x158] sm:$0xff]   ;;  %v2860_v9 = vld [vmem:[%s3459_s1 + $0x160] sm:$0xff]  }
 0x858   :  { %v1525_v14 = vpack.c.bf16 %v1518_v11, %v1517_v10  ;;  %v2739_v15 = vpop.f32.mrb[36].mxu0  ;;  %v1717_v10 = vpop.permute.xlu0 %1716 }
 0x859   :  { %v1511_v16 = vadd.f32 %v2739_v15, %v1413_v13  ;;  %v1502_v17 = vpop.f32.mrb[37].mxu0  ;;  %v1722_v11 = vpop.permute.xlu1 %1721 }
 0x85a   :  { %v1503_v19 = vadd.f32 %v1502_v17, %v1403_v1  ;;  %v2740_v20 = vpop.f32.mrb[38].mxu0  ;;  %2741 = vmatprep.subr.bf16.mxu1 %v1525_v14 }
 0x85b   :  { %v1514_v21 = vadd.f32 %v2740_v20, %v1418_v18  ;;  %v1505_v22 = vpop.f32.mrb[39].mxu0  ;;  %2742 = vmatpush3.bf16.msra.mxu1 %v1525_v14  ;;  %v1523_v24 = vmax.f32 %v1511_v16, 0.0 }
 0x85c   :  { %v1506_v23 = vadd.f32 %v1505_v22, %v1408_v6  ;;  %2743 = vmatprep.subr.bf16.mxu1 %v1526_v12  ;;  %v1521_v26 = vmax.f32 %v1503_v19, 0.0  ;;  %v2857_v6 = vld [vmem:[%s3459_s1 + $0x148] sm:$0xff]  }
 0x85d   :  { %v1524_v25 = vmax.f32 %v1514_v21, 0.0  ;;  %v1732_v13 = vpop.permute.xlu1 %1731 }
 0x85e   :  { %v1522_v27 = vmax.f32 %v1506_v23, 0.0 }
 0x85f   :  { %v1528_v28 = vpack.c.bf16 %v1524_v25, %v1523_v24  ;;  %2744 = vmatpush3.bf16.msra.mxu1 %v1526_v12  ;;  %v1727_v12 = vpop.permute.xlu0 %1726 }
 0x860   :  { %v1527_v29 = vpack.c.bf16 %v1522_v27, %v1521_v26 }
 0x861   :  { %v1742_v22 = vpop.permute.xlu1 %1741 }
 0x862   :  { %2745 = vmatprep.subr.bf16.mxu1 %v1527_v29 }
 0x863   :  { %2746 = vmatpush3.bf16.msra.mxu1 %v1527_v29  ;;  %v1737_v17 = vpop.permute.xlu0 %1736 }
 0x864   :  { %2747 = vmatprep.subr.bf16.mxu1 %v1528_v28 }
 0x867   :  { %2748 = vmatpush3.bf16.msra.mxu1 %v1528_v28  ;;  %v1747_v29 = vpop.permute.xlu0 %1746 }
 0x86a   :  { %2750 = vmatmul.mubr.msk.bf16.vlgmr.msra.gmra.mrb[32].mxu1 %vm103_vm0, %v2853_v30 }
 0x86b   :  { %2753 = vmatprep.mubr.msk.bf16.mxu1 %vm103_vm0, %v2854_v31 }
 0x872   :  { %2754 = vmatmul.mubr.msk.bf16.gmra.mrb[36].mxu1 %vm103_vm0, %v2855_v32 }
 0x873   :  { %2781 = vmatprep.mubr.msk.bf16.mxu1 %vm103_vm0, %v2860_v9 }
 0x93d   :  { %v2751_v38 = vpop.f32.mrb[32].mxu1 }
 0x93e   :  { %v1662_v39 = vadd.f32 %v2751_v38, %v1560_v36  ;;  %v1653_v40 = vpop.f32.mrb[33].mxu1 }
 0x93f   :  { %v1654_v42 = vadd.f32 %v1653_v40, %v1550_v34  ;;  %v2752_v43 = vpop.f32.mrb[34].mxu1  ;;  %v1752_v34 = vpop.permute.xlu1 %1751 }
 0x940   :  { %v1665_v44 = vadd.f32 %v2752_v43, %v1565_v37  ;;  %v1656_v45 = vpop.f32.mrb[35].mxu1  ;;  %v1686_v48 = vmax.f32 %v1662_v39, 0.0 }
 0x941   :  { %v1657_v47 = vadd.f32 %v1656_v45, %v1555_v35  ;;  %v1684_v50 = vmax.f32 %v1654_v42, 0.0 }
 0x942   :  { %v1687_v49 = vmax.f32 %v1665_v44, 0.0 }
 0x943   :  { %v1685_v51 = vmax.f32 %v1657_v47, 0.0  ;;  %v2862_v47 = vld [vmem:[%s3459_s1 + $0x170] sm:$0xff]  }
 0x944   :  { %v1693_v52 = vpack.c.bf16 %v1687_v49, %v1686_v48  ;;  %v2863_v48 = vld [vmem:[%s3459_s1 + $0x178] sm:$0xff]   ;;  %v2864_v49 = vld [vmem:[%s3459_s1 + $0x180] sm:$0xff]  }
 0x945   :  { %v1692_v54 = vpack.c.bf16 %v1685_v51, %v1684_v50  ;;  %v2755_v55 = vpop.f32.mrb[36].mxu1  ;;  %v2865_v50 = vld [vmem:[%s3459_s1 + $0x190] sm:$0xff]   ;;  %v1884_v51 = vpop.permute.xlu0 %1883 }
 0x946   :  { %v1678_v56 = vadd.f32 %v2755_v55, %v1580_v53  ;;  %v1669_v57 = vpop.f32.mrb[37].mxu1 }
 0x947   :  { %v1670_v59 = vadd.f32 %v1669_v57, %v1570_v41  ;;  %v2756_v60 = vpop.f32.mrb[38].mxu1  ;;  %2757 = vmatprep.subr.bf16.mxu0 %v1692_v54 }
 0x948   :  { %v1681_v61 = vadd.f32 %v2756_v60, %v1585_v58  ;;  %v1672_v62 = vpop.f32.mrb[39].mxu1  ;;  %2758 = vmatpush3.bf16.msra.mxu0 %v1692_v54  ;;  %v1690_v0 = vmax.f32 %v1678_v56, 0.0 }
 0x949   :  { %v1673_v63 = vadd.f32 %v1672_v62, %v1575_v46  ;;  %2759 = vmatprep.subr.bf16.mxu0 %v1693_v52  ;;  %v1688_v2 = vmax.f32 %v1670_v59, 0.0  ;;  %v2861_v46 = vld [vmem:[%s3459_s1 + $0x168] sm:$0xff]   ;;  %v1894_v53 = vpop.permute.xlu0 %1893 }
 0x94a   :  { %v1691_v1 = vmax.f32 %v1681_v61, 0.0 }
 0x94b   :  { %v1689_v3 = vmax.f32 %v1673_v63, 0.0 }
 0x94c   :  { %v1695_v4 = vpack.c.bf16 %v1691_v1, %v1690_v0  ;;  %2760 = vmatpush3.bf16.msra.mxu0 %v1693_v52  ;;  %v1889_v52 = vpop.permute.xlu1 %1888 }
 0x94d   :  { %v1694_v5 = vpack.c.bf16 %v1689_v3, %v1688_v2  ;;  %v1904_v58 = vpop.permute.xlu0 %1903 }
 0x94f   :  { %2761 = vmatprep.subr.bf16.mxu0 %v1694_v5 }
 0x950   :  { %2762 = vmatpush3.bf16.msra.mxu0 %v1694_v5  ;;  %v1899_v54 = vpop.permute.xlu1 %1898 }
 0x951   :  { %2763 = vmatprep.subr.bf16.mxu0 %v1695_v4 }
 0x954   :  { %2764 = vmatpush3.bf16.msra.mxu0 %v1695_v4  ;;  %v1909_v63 = vpop.permute.xlu1 %1908 }
 0x957   :  { %2766 = vmatmul.mubr.msk.bf16.vlgmr.msra.gmra.mrb[40].mxu0 %vm103_vm0, %v2857_v6  ;;  %v1914_v6 = vpop.permute.xlu0 %1913 }
 0x958   :  { %2769 = vmatprep.mubr.msk.bf16.mxu0 %vm103_vm0, %v2858_v7 }
 0x95f   :  { %2770 = vmatmul.mubr.msk.bf16.gmra.mrb[44].mxu0 %vm103_vm0, %v2859_v8 }
 0x960   :  { %2797 = vmatprep.mubr.msk.bf16.mxu0 %vm103_vm0, %v2864_v49 }
 0xa2a   :  { %v2767_v14 = vpop.f32.mrb[40].mxu0 }
 0xa2b   :  { %v1829_v15 = vadd.f32 %v2767_v14, %v1727_v12  ;;  %v1820_v16 = vpop.f32.mrb[41].mxu0 }
 0xa2c   :  { %v1821_v18 = vadd.f32 %v1820_v16, %v1717_v10  ;;  %v2768_v19 = vpop.f32.mrb[42].mxu0 }
 0xa2d   :  { %v1832_v20 = vadd.f32 %v2768_v19, %v1732_v13  ;;  %v1823_v21 = vpop.f32.mrb[43].mxu0  ;;  %v1853_v24 = vmax.f32 %v1829_v15, 0.0 }
 0xa2e   :  { %v1824_v23 = vadd.f32 %v1823_v21, %v1722_v11  ;;  %v1851_v26 = vmax.f32 %v1821_v18, 0.0  ;;  %v1919_v11 = vpop.permute.xlu1 %1918 }
 0xa2f   :  { %v1854_v25 = vmax.f32 %v1832_v20, 0.0 }
 0xa30   :  { %v1852_v27 = vmax.f32 %v1824_v23, 0.0  ;;  %v2866_v23 = vld [vmem:[%s3459_s1 + $0x188] sm:$0xff]  }
 0xa31   :  { %v1860_v28 = vpack.c.bf16 %v1854_v25, %v1853_v24  ;;  %v2867_v24 = vld [vmem:[%s3459_s1 + $0x198] sm:$0xff]  }
 0xa32   :  { %v1859_v30 = vpack.c.bf16 %v1852_v27, %v1851_v26  ;;  %v2771_v31 = vpop.f32.mrb[44].mxu0  ;;  %v2056_v25 = vpop.permute.xlu1 %2055 }
 0xa33   :  { %v1845_v32 = vadd.f32 %v2771_v31, %v1747_v29  ;;  %v1836_v33 = vpop.f32.mrb[45].mxu0  ;;  %v2051_v26 = vpop.permute.xlu0 %2050 }
 0xa34   :  { %v1837_v35 = vadd.f32 %v1836_v33, %v1737_v17  ;;  %v2772_v36 = vpop.f32.mrb[46].mxu0  ;;  %2773 = vmatprep.subr.bf16.mxu1 %v1859_v30 }
 0xa35   :  { %v1848_v37 = vadd.f32 %v2772_v36, %v1752_v34  ;;  %v1839_v38 = vpop.f32.mrb[47].mxu0  ;;  %2774 = vmatpush3.bf16.msra.mxu1 %v1859_v30  ;;  %v1857_v40 = vmax.f32 %v1845_v32, 0.0 }
 0xa36   :  { %v1840_v39 = vadd.f32 %v1839_v38, %v1742_v22  ;;  %2775 = vmatprep.subr.bf16.mxu1 %v1860_v28  ;;  %v1855_v42 = vmax.f32 %v1837_v35, 0.0  ;;  %v2066_v27 = vpop.permute.xlu1 %2065 }
 0xa37   :  { %v1858_v41 = vmax.f32 %v1848_v37, 0.0 }
 0xa38   :  { %v1856_v43 = vmax.f32 %v1840_v39, 0.0 }
 0xa39   :  { %v1862_v44 = vpack.c.bf16 %v1858_v41, %v1857_v40  ;;  %2776 = vmatpush3.bf16.msra.mxu1 %v1860_v28  ;;  %v2061_v28 = vpop.permute.xlu0 %2060 }
 0xa3a   :  { %v1861_v45 = vpack.c.bf16 %v1856_v43, %v1855_v42  ;;  %v2076_v29 = vpop.permute.xlu1 %2075 }
 0xa3c   :  { %2777 = vmatprep.subr.bf16.mxu1 %v1861_v45 }
 0xa3d   :  { %2778 = vmatpush3.bf16.msra.mxu1 %v1861_v45  ;;  %v2071_v30 = vpop.permute.xlu0 %2070 }
 0xa3e   :  { %2779 = vmatprep.subr.bf16.mxu1 %v1862_v44  ;;  %v2086_v31 = vpop.permute.xlu1 %2085 }
 0xa41   :  { %2780 = vmatpush3.bf16.msra.mxu1 %v1862_v44  ;;  %v2081_v32 = vpop.permute.xlu0 %2080 }
 0xa44   :  { %2782 = vmatmul.mubr.msk.bf16.vlgmr.msra.gmra.mrb[40].mxu1 %vm103_vm0, %v2861_v46 }
 0xa45   :  { %2785 = vmatprep.mubr.msk.bf16.mxu1 %vm103_vm0, %v2862_v47 }
 0xa4c   :  { %2786 = vmatmul.mubr.msk.bf16.gmra.mrb[44].mxu1 %vm103_vm0, %v2863_v48 }
 0xa4d   :  { %2801 = vmatprep.mubr.msk.bf16.mxu1 %vm103_vm0, %v2865_v50 }
 0xb17   :  { %v2783_v55 = vpop.f32.mrb[40].mxu1 }
 0xb18   :  { %v1996_v56 = vadd.f32 %v2783_v55, %v1894_v53  ;;  %v1987_v57 = vpop.f32.mrb[41].mxu1 }
 0xb19   :  { %v1988_v59 = vadd.f32 %v1987_v57, %v1884_v51  ;;  %v2784_v60 = vpop.f32.mrb[42].mxu1 }
 0xb1a   :  { %v1999_v61 = vadd.f32 %v2784_v60, %v1899_v54  ;;  %v1990_v62 = vpop.f32.mrb[43].mxu1  ;;  %v2020_v1 = vmax.f32 %v1996_v56, 0.0 }
 0xb1b   :  { %v1991_v0 = vadd.f32 %v1990_v62, %v1889_v52  ;;  %v2018_v3 = vmax.f32 %v1988_v59, 0.0 }
 0xb1c   :  { %v2021_v2 = vmax.f32 %v1999_v61, 0.0 }
 0xb1d   :  { %v2019_v4 = vmax.f32 %v1991_v0, 0.0 }
 0xb1e   :  { %v2027_v5 = vpack.c.bf16 %v2021_v2, %v2020_v1 }
 0xb1f   :  { %v2026_v7 = vpack.c.bf16 %v2019_v4, %v2018_v3  ;;  %v2787_v8 = vpop.f32.mrb[44].mxu1 }
 0xb20   :  { %v2012_v9 = vadd.f32 %v2787_v8, %v1914_v6  ;;  %v2003_v10 = vpop.f32.mrb[45].mxu1 }
 0xb21   :  { %v2004_v12 = vadd.f32 %v2003_v10, %v1904_v58  ;;  %v2788_v13 = vpop.f32.mrb[46].mxu1  ;;  %2789 = vmatprep.subr.bf16.mxu0 %v2026_v7  ;;  %2805 = vmatprep.subr.bf16.mxu1 %v2026_v7 }
 0xb22   :  { %v2015_v14 = vadd.f32 %v2788_v13, %v1919_v11  ;;  %v2006_v15 = vpop.f32.mrb[47].mxu1  ;;  %2790 = vmatpush3.bf16.msra.mxu0 %v2026_v7  ;;  %2809 = vmatpush3.bf16.msra.mxu1 %v2026_v7  ;;  %v2024_v17 = vmax.f32 %v2012_v9, 0.0 }
 0xb23   :  { %v2007_v16 = vadd.f32 %v2006_v15, %v1909_v63  ;;  %2791 = vmatprep.subr.bf16.mxu0 %v2027_v5  ;;  %2806 = vmatprep.subr.bf16.mxu1 %v2027_v5  ;;  %v2022_v19 = vmax.f32 %v2004_v12, 0.0 }
 0xb24   :  { %v2025_v18 = vmax.f32 %v2015_v14, 0.0 }
 0xb25   :  { %v2023_v20 = vmax.f32 %v2007_v16, 0.0 }
 0xb26   :  { %v2029_v21 = vpack.c.bf16 %v2025_v18, %v2024_v17  ;;  %2792 = vmatpush3.bf16.msra.mxu0 %v2027_v5  ;;  %2810 = vmatpush3.bf16.msra.mxu1 %v2027_v5 }
 0xb27   :  { %v2028_v22 = vpack.c.bf16 %v2023_v20, %v2022_v19 }
 0xb29   :  { %2793 = vmatprep.subr.bf16.mxu0 %v2028_v22  ;;  %2807 = vmatprep.subr.bf16.mxu1 %v2028_v22 }
 0xb2a   :  { %2794 = vmatpush3.bf16.msra.mxu0 %v2028_v22  ;;  %2811 = vmatpush3.bf16.msra.mxu1 %v2028_v22 }
 0xb2b   :  { %2795 = vmatprep.subr.bf16.mxu0 %v2029_v21  ;;  %2808 = vmatprep.subr.bf16.mxu1 %v2029_v21 }
 0xb2e   :  { %2796 = vmatpush3.bf16.msra.mxu0 %v2029_v21  ;;  %2812 = vmatpush3.bf16.msra.mxu1 %v2029_v21 }
 0xb31   :  { %2798 = vmatmul.mubr.msk.bf16.vlgmr.msra.gmra.mrb[48].mxu0 %vm103_vm0, %v2866_v23  ;;  %2802 = vmatmul.mubr.msk.bf16.vlgmr.msra.gmra.mrb[48].mxu1 %vm103_vm0, %v2867_v24 }
 0xc04   :  { %v2799_v33 = vpop.f32.mrb[48].mxu0  ;;  %v2803_v34 = vpop.f32.mrb[48].mxu1 }
 0xc05   :  { %v2163_v35 = vadd.f32 %v2799_v33, %v2061_v28  ;;  %v2179_v36 = vadd.f32 %v2803_v34, %v2081_v32  ;;  %v2154_v37 = vpop.f32.mrb[49].mxu0  ;;  %v2170_v38 = vpop.f32.mrb[49].mxu1 }
 0xc06   :  { %v2155_v39 = vadd.f32 %v2154_v37, %v2051_v26  ;;  %v2171_v40 = vadd.f32 %v2170_v38, %v2071_v30  ;;  %v2800_v41 = vpop.f32.mrb[50].mxu0  ;;  %v2804_v42 = vpop.f32.mrb[50].mxu1 }
 0xc07   :  { %2187 = vst [vmem:[%s3460_s3 + $0x10] sm:$0xff] %v2163_v35  ;;  %2191 = vst [vmem:[%s3460_s3 + $0x30] sm:$0xff] %v2179_v36  ;;  %v2166_v43 = vadd.f32 %v2800_v41, %v2066_v27  ;;  %v2182_v44 = vadd.f32 %v2804_v42, %v2086_v31  ;;  %v2157_v45 = vpop.f32.mrb[51].mxu0  ;;  %v2173_v46 = vpop.f32.mrb[51].mxu1 }
 0xc08   :  { %2185 = vst [vmem:[%s3460_s3] sm:$0xff] %v2155_v39  ;;  %2189 = vst [vmem:[%s3460_s3 + $0x20] sm:$0xff] %v2171_v40  ;;  %v2158_v47 = vadd.f32 %v2157_v45, %v2056_v25  ;;  %v2174_v48 = vadd.f32 %v2173_v46, %v2076_v29 }
 0xc09   :  { %2188 = vst [vmem:[%s3460_s3 + $0x18] sm:$0xff] %v2166_v43  ;;  %2192 = vst [vmem:[%s3460_s3 + $0x38] sm:$0xff] %v2182_v44 }
 0xc0a   :  { %2186 = vst [vmem:[%s3460_s3 + $0x8] sm:$0xff] %v2158_v47  ;;  %2190 = vst [vmem:[%s3460_s3 + $0x28] sm:$0xff] %v2174_v48 }

</bundles_post_ra>
